<compile_context>
chip_gen: v7x
topology: tpu7x:2x2x1
jax: 0.10.0
libtpu: 0.0.40
codegen_flags: <defaults>
</compile_context>

<pallas_src>
import functools

import jax
import jax.numpy as jnp
from jax import lax
from jax.experimental import pallas as pl
from jax.experimental.pallas import tpu as pltpu

EPS = 1e-5
_VMEM_SPEC = pl.BlockSpec(memory_space=pltpu.MemorySpace.VMEM)


# ----------------------------------------------------------------------------
# Fused kernel: bn(cont) -> multi-layer LSTM -> [lin->relu->bn]* -> out linear
# ----------------------------------------------------------------------------
def _fused_kernel(n_lstm, n_lin, *refs):
    it = iter(refs)
    x_emb_ref = next(it)          # (B, n_emb)
    x_cont_ref = next(it)         # (B, n_cont)
    bng_ref = next(it)            # (1, n_cont)
    bnb_ref = next(it)            # (1, n_cont)
    xs_ref = next(it)             # (T, B, I)
    lstm = [(next(it), next(it), next(it)) for _ in range(n_lstm)]
    h0_ref = next(it)             # (L, B, H)
    c0_ref = next(it)             # (L, B, H)
    # first linear has its weight pre-split into (emb, cont, h) row blocks
    lin0 = tuple(next(it) for _ in range(6))
    lin_rest = [tuple(next(it) for _ in range(4)) for _ in range(n_lin - 1)]
    wout_ref = next(it)           # (d_last, out_sz)
    bout_ref = next(it)           # (1, out_sz)
    out_ref = next(it)            # (B, out_sz)
    seq_scr = next(it)            # scratch (T, B, H)

    T, B, _ = xs_ref.shape
    H = h0_ref.shape[-1]

    # --- BatchNorm1d over continuous features (training-mode batch stats) ---
    xc = x_cont_ref[...]
    mu = jnp.mean(xc, axis=0, keepdims=True)
    var = jnp.mean((xc - mu) ** 2, axis=0, keepdims=True)
    x_cont_bn = (xc - mu) * lax.rsqrt(var + EPS) * bng_ref[...] + bnb_ref[...]
    # TODO(synk): running_mean/running_var updates not tracked (train-mode fwd).

    # --- multi-layer LSTM, everything resident in VMEM ---------------------
    layer_in = xs_ref[...]                                    # (T, B, I)
    h_last = None
    for l, (wih_ref, whh_ref, b_ref) in enumerate(lstm):
        in_sz = layer_in.shape[-1]
        # Hoisted input projection: one MXU matmul for the whole sequence,
        # bias (b_ih + b_hh) folded in here (outside the recurrent loop).
        xproj = (jnp.dot(layer_in.reshape(T * B, in_sz), wih_ref[...],
                         preferred_element_type=jnp.float32)
                 + b_ref[...]).reshape(T, B, 4 * H)
        whh = whh_ref[...]
        h = h0_ref[l]
        c = c0_ref[l]
        last_layer = (l == n_lstm - 1)
        # Fully-unrolled (static T) recurrence: only h @ w_hh on the serial path.
        for t in range(T):
            gates = xproj[t] + jnp.dot(h, whh,
                                       preferred_element_type=jnp.float32)
            i_g = jax.nn.sigmoid(gates[:, 0 * H:1 * H])       # PyTorch order i,f,g,o
            f_g = jax.nn.sigmoid(gates[:, 1 * H:2 * H])
            g_g = jnp.tanh(gates[:, 2 * H:3 * H])
            o_g = jax.nn.sigmoid(gates[:, 3 * H:4 * H])
            c = f_g * c + i_g * g_g
            h = o_g * jnp.tanh(c)
            if not last_layer:
                seq_scr[t] = h                                # feeds next layer
        if not last_layer:
            layer_in = seq_scr[...]
        # TODO(synk): inter-layer LSTM dropout omitted (rnn_drop=0.0 here).
        h_last = h                                            # output[-1] of layer

    # --- Linear -> ReLU -> BatchNorm stack (Dropout p=0 -> identity) -------
    # First layer: split-weight matmuls replace concat([emb, bn(cont), h_T]).
    w0e, w0c, w0h, b0, g0, be0 = lin0
    a = (jnp.dot(x_emb_ref[...], w0e[...], preferred_element_type=jnp.float32)
         + jnp.dot(x_cont_bn, w0c[...], preferred_element_type=jnp.float32)
         + jnp.dot(h_last, w0h[...], preferred_element_type=jnp.float32)
         + b0[...])
    a = jnp.maximum(a, 0.0)
    mu = jnp.mean(a, axis=0, keepdims=True)
    var = jnp.mean((a - mu) ** 2, axis=0, keepdims=True)
    x = (a - mu) * lax.rsqrt(var + EPS) * g0[...] + be0[...]

    for (w_ref, b_ref, gm_ref, bt_ref) in lin_rest:
        a = jnp.dot(x, w_ref[...], preferred_element_type=jnp.float32) + b_ref[...]
        a = jnp.maximum(a, 0.0)
        mu = jnp.mean(a, axis=0, keepdims=True)
        var = jnp.mean((a - mu) ** 2, axis=0, keepdims=True)
        x = (a - mu) * lax.rsqrt(var + EPS) * gm_ref[...] + bt_ref[...]

    # --- output head (folded into the same kernel) --------------------------
    out_ref[...] = (jnp.dot(x, wout_ref[...], preferred_element_type=jnp.float32)
                    + bout_ref[...])


# ----------------------------------------------------------------------------
# Parameter construction (mirrors the PyTorch __init__ shapes / init)
# ----------------------------------------------------------------------------
def init_params(key, emb_szs, n_cont, szs, rnn_hidden_sz, rnn_input_sz,
                rnn_n_layers, out_sz):
    params = {}
    keys = iter(jax.random.split(key, 64))

    # Embeddings: uniform(-sc, sc), sc = 2/(dim+1)
    emb_tables = []
    for c, s in emb_szs:
        sc = 2.0 / (s + 1)
        emb_tables.append(jax.random.uniform(next(keys), (c, s), jnp.float32,
                                             minval=-sc, maxval=sc))
    params["emb_tables"] = emb_tables
    n_emb = sum(s for _, s in emb_szs)

    # BatchNorm over continuous inputs (gamma=1, beta=0 default init)
    params["bn_cont_gamma"] = jnp.ones((1, n_cont), jnp.float32)
    params["bn_cont_beta"] = jnp.zeros((1, n_cont), jnp.float32)

    # LSTM layer params (weights stored transposed: (in, 4H), (H, 4H)).
    # Bias is sampled as b_ih + b_hh (two independent uniforms) to match the
    # PyTorch initialization distribution.
    H = rnn_hidden_sz
    lstm = []
    for l in range(rnn_n_layers):
        in_sz = rnn_input_sz if l == 0 else H
        bound = 1.0 / jnp.sqrt(H)
        w_ih = jax.random.uniform(next(keys), (in_sz, 4 * H), jnp.float32,
                                  minval=-bound, maxval=bound)
        w_hh = jax.random.uniform(next(keys), (H, 4 * H), jnp.float32,
                                  minval=-bound, maxval=bound)
        b_ih = jax.random.uniform(next(keys), (1, 4 * H), jnp.float32,
                                  minval=-bound, maxval=bound)
        b_hh = jax.random.uniform(next(keys), (1, 4 * H), jnp.float32,
                                  minval=-bound, maxval=bound)
        lstm.append((w_ih, w_hh, b_ih + b_hh))
    params["lstm"] = lstm

    # Hidden linear stack: sizes [n_emb + n_cont + H] + szs
    full_szs = [n_emb + n_cont + H] + list(szs)
    lins = []
    for i in range(len(full_szs) - 1):
        din, dout = full_szs[i], full_szs[i + 1]
        std = jnp.sqrt(2.0 / din)  # kaiming normal, fan_in
        w = std * jax.random.normal(next(keys), (din, dout), jnp.float32)
        bound = 1.0 / jnp.sqrt(din)
        b = jax.random.uniform(next(keys), (1, dout), jnp.float32,
                               minval=-bound, maxval=bound)
        g = jnp.ones((1, dout), jnp.float32)
        be = jnp.zeros((1, dout), jnp.float32)
        lins.append((w, b, g, be))
    params["lins"] = lins

    # Output head
    din = full_szs[-1]
    std = jnp.sqrt(2.0 / din)
    params["outp_w"] = std * jax.random.normal(next(keys), (din, out_sz),
                                               jnp.float32)
    bound = 1.0 / jnp.sqrt(din)
    params["outp_b"] = jax.random.uniform(next(keys), (1, out_sz), jnp.float32,
                                          minval=-bound, maxval=bound)
    return params


# ----------------------------------------------------------------------------
# Forward pass: embedding gathers stay in XLA; everything else is one kernel.
# ----------------------------------------------------------------------------
def structured_net_forward(params, x_cat, x_cont, seqs, hidden):
    # Embedding lookups (gather glue) + concat; emb_drop p=0 -> identity.
    embs = [jnp.take(tbl, x_cat[:, i], axis=0)
            for i, tbl in enumerate(params["emb_tables"])]
    x_emb = jnp.concatenate(embs, axis=1)                      # (B, n_emb)
    n_emb = x_emb.shape[1]
    n_cont = x_cont.shape[1]

    # seqs: (B, I, T) -> (T, B, I)  (== seqs.transpose(1,0).transpose(2,0))
    xs = jnp.transpose(seqs, (2, 0, 1))
    h0, c0 = hidden
    T, B, _ = xs.shape
    H = h0.shape[-1]
    out_sz = params["outp_w"].shape[1]
    n_lstm = len(params["lstm"])
    n_lin = len(params["lins"])

    args = [x_emb, x_cont, params["bn_cont_gamma"], params["bn_cont_beta"], xs]
    for (w_ih, w_hh, b) in params["lstm"]:
        args += [w_ih, w_hh, b]
    args += [h0, c0]

    # Split the first linear weight into (emb | cont | h) row blocks so the
    # kernel never concatenates along lanes.
    w0, b0, g0, be0 = params["lins"][0]
    args += [w0[:n_emb], w0[n_emb:n_emb + n_cont], w0[n_emb + n_cont:],
             b0, g0, be0]
    for (w, b, g, be) in params["lins"][1:]:
        args += [w, b, g, be]
    args += [params["outp_w"], params["outp_b"]]

    kernel = functools.partial(_fused_kernel, n_lstm, n_lin)
    return pl.pallas_call(
        kernel,
        out_shape=jax.ShapeDtypeStruct((B, out_sz), jnp.float32),
        in_specs=[_VMEM_SPEC] * len(args),
        out_specs=_VMEM_SPEC,
        scratch_shapes=[pltpu.VMEM((T, B, H), jnp.float32)],
    )(*args)


# ----------------------------------------------------------------------------
if __name__ == "__main__":
    # Small configuration consistent with the module's __init__ signature.
    emb_szs = [(10, 4), (8, 3)]      # -> n_emb = 7
    n_cont = 5
    szs = [32, 16]                   # hidden linear sizes
    rnn_hidden_sz = 32               # 4H = 128 -> lane-dense gate tensor
    rnn_input_sz = 8
    rnn_n_layers = 2
    out_sz = 1
    B, T = 8, 8

    key = jax.random.PRNGKey(0)
    pkey, k_cat, k_cont, k_seq = jax.random.split(key, 4)
    params = init_params(pkey, emb_szs, n_cont, szs, rnn_hidden_sz,
                         rnn_input_sz, rnn_n_layers, out_sz)

    x_cat = jnp.stack(
        [jax.random.randint(jax.random.fold_in(k_cat, i), (B,), 0, c)
         for i, (c, _) in enumerate(emb_szs)], axis=1).astype(jnp.int32)
    x_cont = jax.random.normal(k_cont, (B, n_cont), jnp.float32)
    seqs = jax.random.normal(k_seq, (B, rnn_input_sz, T), jnp.float32)
    hidden = (jnp.zeros((rnn_n_layers, B, rnn_hidden_sz), jnp.float32),
              jnp.zeros((rnn_n_layers, B, rnn_hidden_sz), jnp.float32))

    fwd = jax.jit(structured_net_forward)
    out = fwd(params, x_cat, x_cont, seqs, hidden)
    out = jax.block_until_ready(out)
    assert out.shape == (B, out_sz)
    print("KERNEL_OK")
</pallas_src>

<mosaic_0001>
module attributes {stable_mosaic.version = 11 : i64} {
  func.func @_fused_kernel(%arg0: memref<8x7xf32, #tpu.memory_space<vmem>>, %arg1: memref<8x5xf32, #tpu.memory_space<vmem>>, %arg2: memref<1x5xf32, #tpu.memory_space<vmem>>, %arg3: memref<1x5xf32, #tpu.memory_space<vmem>>, %arg4: memref<8x8x8xf32, #tpu.memory_space<vmem>>, %arg5: memref<8x128xf32, #tpu.memory_space<vmem>>, %arg6: memref<32x128xf32, #tpu.memory_space<vmem>>, %arg7: memref<1x128xf32, #tpu.memory_space<vmem>>, %arg8: memref<32x128xf32, #tpu.memory_space<vmem>>, %arg9: memref<32x128xf32, #tpu.memory_space<vmem>>, %arg10: memref<1x128xf32, #tpu.memory_space<vmem>>, %arg11: memref<2x8x32xf32, #tpu.memory_space<vmem>>, %arg12: memref<2x8x32xf32, #tpu.memory_space<vmem>>, %arg13: memref<7x32xf32, #tpu.memory_space<vmem>>, %arg14: memref<5x32xf32, #tpu.memory_space<vmem>>, %arg15: memref<32x32xf32, #tpu.memory_space<vmem>>, %arg16: memref<1x32xf32, #tpu.memory_space<vmem>>, %arg17: memref<1x32xf32, #tpu.memory_space<vmem>>, %arg18: memref<1x32xf32, #tpu.memory_space<vmem>>, %arg19: memref<32x16xf32, #tpu.memory_space<vmem>>, %arg20: memref<1x16xf32, #tpu.memory_space<vmem>>, %arg21: memref<1x16xf32, #tpu.memory_space<vmem>>, %arg22: memref<1x16xf32, #tpu.memory_space<vmem>>, %arg23: memref<16x1xf32, #tpu.memory_space<vmem>>, %arg24: memref<1x1xf32, #tpu.memory_space<vmem>>, %arg25: memref<8x1xf32, #tpu.memory_space<vmem>>, %arg26: memref<8x8x32xf32, #tpu.memory_space<vmem>>) attributes {dimension_semantics = [], scalar_prefetch = 0 : i64, scratch_operands = 1 : i64, tpu.core_type = #tpu.core_type<tc>} {
    %c0 = arith.constant 0 : index
    %c0_0 = arith.constant 0 : index
    %0 = vector.load %arg1[%c0, %c0_0] : memref<8x5xf32, #tpu.memory_space<vmem>>, vector<8x5xf32>
    %cst = arith.constant dense<0.000000e+00> : vector<5xf32>
    %1 = vector.multi_reduction <add>, %0, %cst [0] : vector<8x5xf32> to vector<5xf32>
    %2 = vector.shape_cast %1 : vector<5xf32> to vector<1x5xf32>
    %cst_1 = arith.constant 8.000000e+00 : f32
    %3 = vector.broadcast %cst_1 : f32 to vector<1x5xf32>
    %4 = arith.divf %2, %3 : vector<1x5xf32>
    %5 = vector.broadcast %4 : vector<1x5xf32> to vector<8x5xf32>
    %6 = arith.subf %0, %5 : vector<8x5xf32>
    %7 = arith.mulf %6, %6 : vector<8x5xf32>
    %cst_2 = arith.constant dense<0.000000e+00> : vector<5xf32>
    %8 = vector.multi_reduction <add>, %7, %cst_2 [0] : vector<8x5xf32> to vector<5xf32>
    %9 = vector.shape_cast %8 : vector<5xf32> to vector<1x5xf32>
    %cst_3 = arith.constant 8.000000e+00 : f32
    %10 = vector.broadcast %cst_3 : f32 to vector<1x5xf32>
    %11 = arith.divf %9, %10 : vector<1x5xf32>
    %12 = vector.broadcast %4 : vector<1x5xf32> to vector<8x5xf32>
    %13 = arith.subf %0, %12 : vector<8x5xf32>
    %cst_4 = arith.constant 9.99999974E-6 : f32
    %14 = vector.broadcast %cst_4 : f32 to vector<1x5xf32>
    %15 = arith.addf %11, %14 : vector<1x5xf32>
    %16 = math.rsqrt %15 : vector<1x5xf32>
    %17 = vector.broadcast %16 : vector<1x5xf32> to vector<8x5xf32>
    %18 = arith.mulf %13, %17 : vector<8x5xf32>
    %c0_5 = arith.constant 0 : index
    %c0_6 = arith.constant 0 : index
    %19 = vector.load %arg2[%c0_5, %c0_6] : memref<1x5xf32, #tpu.memory_space<vmem>>, vector<1x5xf32>
    %20 = vector.broadcast %19 : vector<1x5xf32> to vector<8x5xf32>
    %21 = arith.mulf %18, %20 : vector<8x5xf32>
    %c0_7 = arith.constant 0 : index
    %c0_8 = arith.constant 0 : index
    %22 = vector.load %arg3[%c0_7, %c0_8] : memref<1x5xf32, #tpu.memory_space<vmem>>, vector<1x5xf32>
    %23 = vector.broadcast %22 : vector<1x5xf32> to vector<8x5xf32>
    %24 = arith.addf %21, %23 : vector<8x5xf32>
    %c0_9 = arith.constant 0 : index
    %c0_10 = arith.constant 0 : index
    %c0_11 = arith.constant 0 : index
    %25 = vector.load %arg4[%c0_9, %c0_10, %c0_11] : memref<8x8x8xf32, #tpu.memory_space<vmem>>, vector<8x8x8xf32>
    %26 = vector.shape_cast %25 : vector<8x8x8xf32> to vector<64x8xf32>
    %c0_12 = arith.constant 0 : index
    %c0_13 = arith.constant 0 : index
    %27 = vector.load %arg5[%c0_12, %c0_13] : memref<8x128xf32, #tpu.memory_space<vmem>>, vector<8x128xf32>
    %cst_14 = arith.constant dense<0.000000e+00> : vector<64x128xf32>
    %28 = tpu.matmul %26, %27, %cst_14 {dimension_numbers = #tpu.dot_dimension_numbers<[1], [0], [0], [1], [0, 0, 1, 1], [], []>} : vector<64x8xf32>, vector<8x128xf32>, vector<64x128xf32> -> vector<64x128xf32>
    %c0_15 = arith.constant 0 : index
    %c0_16 = arith.constant 0 : index
    %29 = vector.load %arg7[%c0_15, %c0_16] : memref<1x128xf32, #tpu.memory_space<vmem>>, vector<1x128xf32>
    %30 = vector.broadcast %29 : vector<1x128xf32> to vector<64x128xf32>
    %31 = arith.addf %28, %30 : vector<64x128xf32>
    %32 = vector.shape_cast %31 : vector<64x128xf32> to vector<8x8x128xf32>
    %c0_17 = arith.constant 0 : index
    %c0_18 = arith.constant 0 : index
    %33 = vector.load %arg6[%c0_17, %c0_18] : memref<32x128xf32, #tpu.memory_space<vmem>>, vector<32x128xf32>
    %c0_19 = arith.constant 0 : index
    %c0_20 = arith.constant 0 : index
    %c0_21 = arith.constant 0 : index
    %34 = vector.load %arg11[%c0_19, %c0_20, %c0_21] : memref<2x8x32xf32, #tpu.memory_space<vmem>>, vector<1x8x32xf32>
    %35 = vector.shape_cast %34 : vector<1x8x32xf32> to vector<8x32xf32>
    %c0_22 = arith.constant 0 : index
    %c0_23 = arith.constant 0 : index
    %c0_24 = arith.constant 0 : index
    %36 = vector.load %arg12[%c0_22, %c0_23, %c0_24] : memref<2x8x32xf32, #tpu.memory_space<vmem>>, vector<1x8x32xf32>
    %37 = vector.shape_cast %36 : vector<1x8x32xf32> to vector<8x32xf32>
    %38 = vector.extract_strided_slice %32 {offsets = [0, 0, 0], sizes = [1, 8, 128], strides = [1, 1, 1]} : vector<8x8x128xf32> to vector<1x8x128xf32>
    %39 = vector.shape_cast %38 : vector<1x8x128xf32> to vector<8x128xf32>
    %cst_25 = arith.constant dense<0.000000e+00> : vector<8x128xf32>
    %40 = tpu.matmul %35, %33, %cst_25 {dimension_numbers = #tpu.dot_dimension_numbers<[1], [0], [0], [1], [0, 0, 1, 1], [], []>} : vector<8x32xf32>, vector<32x128xf32>, vector<8x128xf32> -> vector<8x128xf32>
    %41 = arith.addf %39, %40 : vector<8x128xf32>
    %42 = vector.extract_strided_slice %41 {offsets = [0, 0], sizes = [8, 32], strides = [1, 1]} : vector<8x128xf32> to vector<8x32xf32>
    %43 = arith.negf %42 : vector<8x32xf32>
    %44 = math.exp %43 : vector<8x32xf32>
    %cst_26 = arith.constant 1.000000e+00 : f32
    %45 = vector.broadcast %cst_26 : f32 to vector<8x32xf32>
    %46 = arith.addf %45, %44 : vector<8x32xf32>
    %47 = arith.divf %45, %46 : vector<8x32xf32>
    %48 = vector.extract_strided_slice %41 {offsets = [0, 32], sizes = [8, 32], strides = [1, 1]} : vector<8x128xf32> to vector<8x32xf32>
    %49 = arith.negf %48 : vector<8x32xf32>
    %50 = math.exp %49 : vector<8x32xf32>
    %cst_27 = arith.constant 1.000000e+00 : f32
    %51 = vector.broadcast %cst_27 : f32 to vector<8x32xf32>
    %52 = arith.addf %51, %50 : vector<8x32xf32>
    %53 = arith.divf %51, %52 : vector<8x32xf32>
    %54 = vector.extract_strided_slice %41 {offsets = [0, 64], sizes = [8, 32], strides = [1, 1]} : vector<8x128xf32> to vector<8x32xf32>
    %55 = math.tanh %54 : vector<8x32xf32>
    %56 = vector.extract_strided_slice %41 {offsets = [0, 96], sizes = [8, 32], strides = [1, 1]} : vector<8x128xf32> to vector<8x32xf32>
    %57 = arith.negf %56 : vector<8x32xf32>
    %58 = math.exp %57 : vector<8x32xf32>
    %cst_28 = arith.constant 1.000000e+00 : f32
    %59 = vector.broadcast %cst_28 : f32 to vector<8x32xf32>
    %60 = arith.addf %59, %58 : vector<8x32xf32>
    %61 = arith.divf %59, %60 : vector<8x32xf32>
    %62 = arith.mulf %53, %37 : vector<8x32xf32>
    %63 = arith.mulf %47, %55 : vector<8x32xf32>
    %64 = arith.addf %62, %63 : vector<8x32xf32>
    %65 = math.tanh %64 : vector<8x32xf32>
    %66 = arith.mulf %61, %65 : vector<8x32xf32>
    %c0_29 = arith.constant 0 : index
    %c0_30 = arith.constant 0 : index
    %c0_31 = arith.constant 0 : index
    %67 = vector.load %arg26[%c0_29, %c0_30, %c0_31] : memref<8x8x32xf32, #tpu.memory_space<vmem>>, vector<1x8x32xf32>
    %68 = vector.shape_cast %67 : vector<1x8x32xf32> to vector<8x32xf32>
    %69 = vector.shape_cast %66 : vector<8x32xf32> to vector<1x8x32xf32>
    tpu.vector_store %arg26[%c0_29, %c0_30, %c0_31], %69 {strides = array<i32>} : memref<8x8x32xf32, #tpu.memory_space<vmem>>, vector<1x8x32xf32>,
    %70 = vector.extract_strided_slice %32 {offsets = [1, 0, 0], sizes = [1, 8, 128], strides = [1, 1, 1]} : vector<8x8x128xf32> to vector<1x8x128xf32>
    %71 = vector.shape_cast %70 : vector<1x8x128xf32> to vector<8x128xf32>
    %cst_32 = arith.constant dense<0.000000e+00> : vector<8x128xf32>
    %72 = tpu.matmul %66, %33, %cst_32 {dimension_numbers = #tpu.dot_dimension_numbers<[1], [0], [0], [1], [0, 0, 1, 1], [], []>} : vector<8x32xf32>, vector<32x128xf32>, vector<8x128xf32> -> vector<8x128xf32>
    %73 = arith.addf %71, %72 : vector<8x128xf32>
    %74 = vector.extract_strided_slice %73 {offsets = [0, 0], sizes = [8, 32], strides = [1, 1]} : vector<8x128xf32> to vector<8x32xf32>
    %75 = arith.negf %74 : vector<8x32xf32>
    %76 = math.exp %75 : vector<8x32xf32>
    %cst_33 = arith.constant 1.000000e+00 : f32
    %77 = vector.broadcast %cst_33 : f32 to vector<8x32xf32>
    %78 = arith.addf %77, %76 : vector<8x32xf32>
    %79 = arith.divf %77, %78 : vector<8x32xf32>
    %80 = vector.extract_strided_slice %73 {offsets = [0, 32], sizes = [8, 32], strides = [1, 1]} : vector<8x128xf32> to vector<8x32xf32>
    %81 = arith.negf %80 : vector<8x32xf32>
    %82 = math.exp %81 : vector<8x32xf32>
    %cst_34 = arith.constant 1.000000e+00 : f32
    %83 = vector.broadcast %cst_34 : f32 to vector<8x32xf32>
    %84 = arith.addf %83, %82 : vector<8x32xf32>
    %85 = arith.divf %83, %84 : vector<8x32xf32>
    %86 = vector.extract_strided_slice %73 {offsets = [0, 64], sizes = [8, 32], strides = [1, 1]} : vector<8x128xf32> to vector<8x32xf32>
    %87 = math.tanh %86 : vector<8x32xf32>
    %88 = vector.extract_strided_slice %73 {offsets = [0, 96], sizes = [8, 32], strides = [1, 1]} : vector<8x128xf32> to vector<8x32xf32>
    %89 = arith.negf %88 : vector<8x32xf32>
    %90 = math.exp %89 : vector<8x32xf32>
    %cst_35 = arith.constant 1.000000e+00 : f32
    %91 = vector.broadcast %cst_35 : f32 to vector<8x32xf32>
    %92 = arith.addf %91, %90 : vector<8x32xf32>
    %93 = arith.divf %91, %92 : vector<8x32xf32>
    %94 = arith.mulf %85, %64 : vector<8x32xf32>
    %95 = arith.mulf %79, %87 : vector<8x32xf32>
    %96 = arith.addf %94, %95 : vector<8x32xf32>
    %97 = math.tanh %96 : vector<8x32xf32>
    %98 = arith.mulf %93, %97 : vector<8x32xf32>
    %c1 = arith.constant 1 : index
    %c0_36 = arith.constant 0 : index
    %c0_37 = arith.constant 0 : index
    %99 = vector.load %arg26[%c1, %c0_36, %c0_37] : memref<8x8x32xf32, #tpu.memory_space<vmem>>, vector<1x8x32xf32>
    %100 = vector.shape_cast %99 : vector<1x8x32xf32> to vector<8x32xf32>
    %101 = vector.shape_cast %98 : vector<8x32xf32> to vector<1x8x32xf32>
    tpu.vector_store %arg26[%c1, %c0_36, %c0_37], %101 {strides = array<i32>} : memref<8x8x32xf32, #tpu.memory_space<vmem>>, vector<1x8x32xf32>,
    %102 = vector.extract_strided_slice %32 {offsets = [2, 0, 0], sizes = [1, 8, 128], strides = [1, 1, 1]} : vector<8x8x128xf32> to vector<1x8x128xf32>
    %103 = vector.shape_cast %102 : vector<1x8x128xf32> to vector<8x128xf32>
    %cst_38 = arith.constant dense<0.000000e+00> : vector<8x128xf32>
    %104 = tpu.matmul %98, %33, %cst_38 {dimension_numbers = #tpu.dot_dimension_numbers<[1], [0], [0], [1], [0, 0, 1, 1], [], []>} : vector<8x32xf32>, vector<32x128xf32>, vector<8x128xf32> -> vector<8x128xf32>
    %105 = arith.addf %103, %104 : vector<8x128xf32>
    %106 = vector.extract_strided_slice %105 {offsets = [0, 0], sizes = [8, 32], strides = [1, 1]} : vector<8x128xf32> to vector<8x32xf32>
    %107 = arith.negf %106 : vector<8x32xf32>
    %108 = math.exp %107 : vector<8x32xf32>
    %cst_39 = arith.constant 1.000000e+00 : f32
    %109 = vector.broadcast %cst_39 : f32 to vector<8x32xf32>
    %110 = arith.addf %109, %108 : vector<8x32xf32>
    %111 = arith.divf %109, %110 : vector<8x32xf32>
    %112 = vector.extract_strided_slice %105 {offsets = [0, 32], sizes = [8, 32], strides = [1, 1]} : vector<8x128xf32> to vector<8x32xf32>
    %113 = arith.negf %112 : vector<8x32xf32>
    %114 = math.exp %113 : vector<8x32xf32>
    %cst_40 = arith.constant 1.000000e+00 : f32
    %115 = vector.broadcast %cst_40 : f32 to vector<8x32xf32>
    %116 = arith.addf %115, %114 : vector<8x32xf32>
    %117 = arith.divf %115, %116 : vector<8x32xf32>
    %118 = vector.extract_strided_slice %105 {offsets = [0, 64], sizes = [8, 32], strides = [1, 1]} : vector<8x128xf32> to vector<8x32xf32>
    %119 = math.tanh %118 : vector<8x32xf32>
    %120 = vector.extract_strided_slice %105 {offsets = [0, 96], sizes = [8, 32], strides = [1, 1]} : vector<8x128xf32> to vector<8x32xf32>
    %121 = arith.negf %120 : vector<8x32xf32>
    %122 = math.exp %121 : vector<8x32xf32>
    %cst_41 = arith.constant 1.000000e+00 : f32
    %123 = vector.broadcast %cst_41 : f32 to vector<8x32xf32>
    %124 = arith.addf %123, %122 : vector<8x32xf32>
    %125 = arith.divf %123, %124 : vector<8x32xf32>
    %126 = arith.mulf %117, %96 : vector<8x32xf32>
    %127 = arith.mulf %111, %119 : vector<8x32xf32>
    %128 = arith.addf %126, %127 : vector<8x32xf32>
    %129 = math.tanh %128 : vector<8x32xf32>
    %130 = arith.mulf %125, %129 : vector<8x32xf32>
    %c2 = arith.constant 2 : index
    %c0_42 = arith.constant 0 : index
    %c0_43 = arith.constant 0 : index
    %131 = vector.load %arg26[%c2, %c0_42, %c0_43] : memref<8x8x32xf32, #tpu.memory_space<vmem>>, vector<1x8x32xf32>
    %132 = vector.shape_cast %131 : vector<1x8x32xf32> to vector<8x32xf32>
    %133 = vector.shape_cast %130 : vector<8x32xf32> to vector<1x8x32xf32>
    tpu.vector_store %arg26[%c2, %c0_42, %c0_43], %133 {strides = array<i32>} : memref<8x8x32xf32, #tpu.memory_space<vmem>>, vector<1x8x32xf32>,
    %134 = vector.extract_strided_slice %32 {offsets = [3, 0, 0], sizes = [1, 8, 128], strides = [1, 1, 1]} : vector<8x8x128xf32> to vector<1x8x128xf32>
    %135 = vector.shape_cast %134 : vector<1x8x128xf32> to vector<8x128xf32>
    %cst_44 = arith.constant dense<0.000000e+00> : vector<8x128xf32>
    %136 = tpu.matmul %130, %33, %cst_44 {dimension_numbers = #tpu.dot_dimension_numbers<[1], [0], [0], [1], [0, 0, 1, 1], [], []>} : vector<8x32xf32>, vector<32x128xf32>, vector<8x128xf32> -> vector<8x128xf32>
    %137 = arith.addf %135, %136 : vector<8x128xf32>
    %138 = vector.extract_strided_slice %137 {offsets = [0, 0], sizes = [8, 32], strides = [1, 1]} : vector<8x128xf32> to vector<8x32xf32>
    %139 = arith.negf %138 : vector<8x32xf32>
    %140 = math.exp %139 : vector<8x32xf32>
    %cst_45 = arith.constant 1.000000e+00 : f32
    %141 = vector.broadcast %cst_45 : f32 to vector<8x32xf32>
    %142 = arith.addf %141, %140 : vector<8x32xf32>
    %143 = arith.divf %141, %142 : vector<8x32xf32>
    %144 = vector.extract_strided_slice %137 {offsets = [0, 32], sizes = [8, 32], strides = [1, 1]} : vector<8x128xf32> to vector<8x32xf32>
    %145 = arith.negf %144 : vector<8x32xf32>
    %146 = math.exp %145 : vector<8x32xf32>
    %cst_46 = arith.constant 1.000000e+00 : f32
    %147 = vector.broadcast %cst_46 : f32 to vector<8x32xf32>
    %148 = arith.addf %147, %146 : vector<8x32xf32>
    %149 = arith.divf %147, %148 : vector<8x32xf32>
    %150 = vector.extract_strided_slice %137 {offsets = [0, 64], sizes = [8, 32], strides = [1, 1]} : vector<8x128xf32> to vector<8x32xf32>
    %151 = math.tanh %150 : vector<8x32xf32>
    %152 = vector.extract_strided_slice %137 {offsets = [0, 96], sizes = [8, 32], strides = [1, 1]} : vector<8x128xf32> to vector<8x32xf32>
    %153 = arith.negf %152 : vector<8x32xf32>
    %154 = math.exp %153 : vector<8x32xf32>
    %cst_47 = arith.constant 1.000000e+00 : f32
    %155 = vector.broadcast %cst_47 : f32 to vector<8x32xf32>
    %156 = arith.addf %155, %154 : vector<8x32xf32>
    %157 = arith.divf %155, %156 : vector<8x32xf32>
    %158 = arith.mulf %149, %128 : vector<8x32xf32>
    %159 = arith.mulf %143, %151 : vector<8x32xf32>
    %160 = arith.addf %158, %159 : vector<8x32xf32>
    %161 = math.tanh %160 : vector<8x32xf32>
    %162 = arith.mulf %157, %161 : vector<8x32xf32>
    %c3 = arith.constant 3 : index
    %c0_48 = arith.constant 0 : index
    %c0_49 = arith.constant 0 : index
    %163 = vector.load %arg26[%c3, %c0_48, %c0_49] : memref<8x8x32xf32, #tpu.memory_space<vmem>>, vector<1x8x32xf32>
    %164 = vector.shape_cast %163 : vector<1x8x32xf32> to vector<8x32xf32>
    %165 = vector.shape_cast %162 : vector<8x32xf32> to vector<1x8x32xf32>
    tpu.vector_store %arg26[%c3, %c0_48, %c0_49], %165 {strides = array<i32>} : memref<8x8x32xf32, #tpu.memory_space<vmem>>, vector<1x8x32xf32>,
    %166 = vector.extract_strided_slice %32 {offsets = [4, 0, 0], sizes = [1, 8, 128], strides = [1, 1, 1]} : vector<8x8x128xf32> to vector<1x8x128xf32>
    %167 = vector.shape_cast %166 : vector<1x8x128xf32> to vector<8x128xf32>
    %cst_50 = arith.constant dense<0.000000e+00> : vector<8x128xf32>
    %168 = tpu.matmul %162, %33, %cst_50 {dimension_numbers = #tpu.dot_dimension_numbers<[1], [0], [0], [1], [0, 0, 1, 1], [], []>} : vector<8x32xf32>, vector<32x128xf32>, vector<8x128xf32> -> vector<8x128xf32>
    %169 = arith.addf %167, %168 : vector<8x128xf32>
    %170 = vector.extract_strided_slice %169 {offsets = [0, 0], sizes = [8, 32], strides = [1, 1]} : vector<8x128xf32> to vector<8x32xf32>
    %171 = arith.negf %170 : vector<8x32xf32>
    %172 = math.exp %171 : vector<8x32xf32>
    %cst_51 = arith.constant 1.000000e+00 : f32
    %173 = vector.broadcast %cst_51 : f32 to vector<8x32xf32>
    %174 = arith.addf %173, %172 : vector<8x32xf32>
    %175 = arith.divf %173, %174 : vector<8x32xf32>
    %176 = vector.extract_strided_slice %169 {offsets = [0, 32], sizes = [8, 32], strides = [1, 1]} : vector<8x128xf32> to vector<8x32xf32>
    %177 = arith.negf %176 : vector<8x32xf32>
    %178 = math.exp %177 : vector<8x32xf32>
    %cst_52 = arith.constant 1.000000e+00 : f32
    %179 = vector.broadcast %cst_52 : f32 to vector<8x32xf32>
    %180 = arith.addf %179, %178 : vector<8x32xf32>
    %181 = arith.divf %179, %180 : vector<8x32xf32>
    %182 = vector.extract_strided_slice %169 {offsets = [0, 64], sizes = [8, 32], strides = [1, 1]} : vector<8x128xf32> to vector<8x32xf32>
    %183 = math.tanh %182 : vector<8x32xf32>
    %184 = vector.extract_strided_slice %169 {offsets = [0, 96], sizes = [8, 32], strides = [1, 1]} : vector<8x128xf32> to vector<8x32xf32>
    %185 = arith.negf %184 : vector<8x32xf32>
    %186 = math.exp %185 : vector<8x32xf32>
    %cst_53 = arith.constant 1.000000e+00 : f32
    %187 = vector.broadcast %cst_53 : f32 to vector<8x32xf32>
    %188 = arith.addf %187, %186 : vector<8x32xf32>
    %189 = arith.divf %187, %188 : vector<8x32xf32>
    %190 = arith.mulf %181, %160 : vector<8x32xf32>
    %191 = arith.mulf %175, %183 : vector<8x32xf32>
    %192 = arith.addf %190, %191 : vector<8x32xf32>
    %193 = math.tanh %192 : vector<8x32xf32>
    %194 = arith.mulf %189, %193 : vector<8x32xf32>
    %c4 = arith.constant 4 : index
    %c0_54 = arith.constant 0 : index
    %c0_55 = arith.constant 0 : index
    %195 = vector.load %arg26[%c4, %c0_54, %c0_55] : memref<8x8x32xf32, #tpu.memory_space<vmem>>, vector<1x8x32xf32>
    %196 = vector.shape_cast %195 : vector<1x8x32xf32> to vector<8x32xf32>
    %197 = vector.shape_cast %194 : vector<8x32xf32> to vector<1x8x32xf32>
    tpu.vector_store %arg26[%c4, %c0_54, %c0_55], %197 {strides = array<i32>} : memref<8x8x32xf32, #tpu.memory_space<vmem>>, vector<1x8x32xf32>,
    %198 = vector.extract_strided_slice %32 {offsets = [5, 0, 0], sizes = [1, 8, 128], strides = [1, 1, 1]} : vector<8x8x128xf32> to vector<1x8x128xf32>
    %199 = vector.shape_cast %198 : vector<1x8x128xf32> to vector<8x128xf32>
    %cst_56 = arith.constant dense<0.000000e+00> : vector<8x128xf32>
    %200 = tpu.matmul %194, %33, %cst_56 {dimension_numbers = #tpu.dot_dimension_numbers<[1], [0], [0], [1], [0, 0, 1, 1], [], []>} : vector<8x32xf32>, vector<32x128xf32>, vector<8x128xf32> -> vector<8x128xf32>
    %201 = arith.addf %199, %200 : vector<8x128xf32>
    %202 = vector.extract_strided_slice %201 {offsets = [0, 0], sizes = [8, 32], strides = [1, 1]} : vector<8x128xf32> to vector<8x32xf32>
    %203 = arith.negf %202 : vector<8x32xf32>
    %204 = math.exp %203 : vector<8x32xf32>
    %cst_57 = arith.constant 1.000000e+00 : f32
    %205 = vector.broadcast %cst_57 : f32 to vector<8x32xf32>
    %206 = arith.addf %205, %204 : vector<8x32xf32>
    %207 = arith.divf %205, %206 : vector<8x32xf32>
    %208 = vector.extract_strided_slice %201 {offsets = [0, 32], sizes = [8, 32], strides = [1, 1]} : vector<8x128xf32> to vector<8x32xf32>
    %209 = arith.negf %208 : vector<8x32xf32>
    %210 = math.exp %209 : vector<8x32xf32>
    %cst_58 = arith.constant 1.000000e+00 : f32
    %211 = vector.broadcast %cst_58 : f32 to vector<8x32xf32>
    %212 = arith.addf %211, %210 : vector<8x32xf32>
    %213 = arith.divf %211, %212 : vector<8x32xf32>
    %214 = vector.extract_strided_slice %201 {offsets = [0, 64], sizes = [8, 32], strides = [1, 1]} : vector<8x128xf32> to vector<8x32xf32>
    %215 = math.tanh %214 : vector<8x32xf32>
    %216 = vector.extract_strided_slice %201 {offsets = [0, 96], sizes = [8, 32], strides = [1, 1]} : vector<8x128xf32> to vector<8x32xf32>
    %217 = arith.negf %216 : vector<8x32xf32>
    %218 = math.exp %217 : vector<8x32xf32>
    %cst_59 = arith.constant 1.000000e+00 : f32
    %219 = vector.broadcast %cst_59 : f32 to vector<8x32xf32>
    %220 = arith.addf %219, %218 : vector<8x32xf32>
    %221 = arith.divf %219, %220 : vector<8x32xf32>
    %222 = arith.mulf %213, %192 : vector<8x32xf32>
    %223 = arith.mulf %207, %215 : vector<8x32xf32>
    %224 = arith.addf %222, %223 : vector<8x32xf32>
    %225 = math.tanh %224 : vector<8x32xf32>
    %226 = arith.mulf %221, %225 : vector<8x32xf32>
    %c5 = arith.constant 5 : index
    %c0_60 = arith.constant 0 : index
    %c0_61 = arith.constant 0 : index
    %227 = vector.load %arg26[%c5, %c0_60, %c0_61] : memref<8x8x32xf32, #tpu.memory_space<vmem>>, vector<1x8x32xf32>
    %228 = vector.shape_cast %227 : vector<1x8x32xf32> to vector<8x32xf32>
    %229 = vector.shape_cast %226 : vector<8x32xf32> to vector<1x8x32xf32>
    tpu.vector_store %arg26[%c5, %c0_60, %c0_61], %229 {strides = array<i32>} : memref<8x8x32xf32, #tpu.memory_space<vmem>>, vector<1x8x32xf32>,
    %230 = vector.extract_strided_slice %32 {offsets = [6, 0, 0], sizes = [1, 8, 128], strides = [1, 1, 1]} : vector<8x8x128xf32> to vector<1x8x128xf32>
    %231 = vector.shape_cast %230 : vector<1x8x128xf32> to vector<8x128xf32>
    %cst_62 = arith.constant dense<0.000000e+00> : vector<8x128xf32>
    %232 = tpu.matmul %226, %33, %cst_62 {dimension_numbers = #tpu.dot_dimension_numbers<[1], [0], [0], [1], [0, 0, 1, 1], [], []>} : vector<8x32xf32>, vector<32x128xf32>, vector<8x128xf32> -> vector<8x128xf32>
    %233 = arith.addf %231, %232 : vector<8x128xf32>
    %234 = vector.extract_strided_slice %233 {offsets = [0, 0], sizes = [8, 32], strides = [1, 1]} : vector<8x128xf32> to vector<8x32xf32>
    %235 = arith.negf %234 : vector<8x32xf32>
    %236 = math.exp %235 : vector<8x32xf32>
    %cst_63 = arith.constant 1.000000e+00 : f32
    %237 = vector.broadcast %cst_63 : f32 to vector<8x32xf32>
    %238 = arith.addf %237, %236 : vector<8x32xf32>
    %239 = arith.divf %237, %238 : vector<8x32xf32>
    %240 = vector.extract_strided_slice %233 {offsets = [0, 32], sizes = [8, 32], strides = [1, 1]} : vector<8x128xf32> to vector<8x32xf32>
    %241 = arith.negf %240 : vector<8x32xf32>
    %242 = math.exp %241 : vector<8x32xf32>
    %cst_64 = arith.constant 1.000000e+00 : f32
    %243 = vector.broadcast %cst_64 : f32 to vector<8x32xf32>
    %244 = arith.addf %243, %242 : vector<8x32xf32>
    %245 = arith.divf %243, %244 : vector<8x32xf32>
    %246 = vector.extract_strided_slice %233 {offsets = [0, 64], sizes = [8, 32], strides = [1, 1]} : vector<8x128xf32> to vector<8x32xf32>
    %247 = math.tanh %246 : vector<8x32xf32>
    %248 = vector.extract_strided_slice %233 {offsets = [0, 96], sizes = [8, 32], strides = [1, 1]} : vector<8x128xf32> to vector<8x32xf32>
    %249 = arith.negf %248 : vector<8x32xf32>
    %250 = math.exp %249 : vector<8x32xf32>
    %cst_65 = arith.constant 1.000000e+00 : f32
    %251 = vector.broadcast %cst_65 : f32 to vector<8x32xf32>
    %252 = arith.addf %251, %250 : vector<8x32xf32>
    %253 = arith.divf %251, %252 : vector<8x32xf32>
    %254 = arith.mulf %245, %224 : vector<8x32xf32>
    %255 = arith.mulf %239, %247 : vector<8x32xf32>
    %256 = arith.addf %254, %255 : vector<8x32xf32>
    %257 = math.tanh %256 : vector<8x32xf32>
    %258 = arith.mulf %253, %257 : vector<8x32xf32>
    %c6 = arith.constant 6 : index
    %c0_66 = arith.constant 0 : index
    %c0_67 = arith.constant 0 : index
    %259 = vector.load %arg26[%c6, %c0_66, %c0_67] : memref<8x8x32xf32, #tpu.memory_space<vmem>>, vector<1x8x32xf32>
    %260 = vector.shape_cast %259 : vector<1x8x32xf32> to vector<8x32xf32>
    %261 = vector.shape_cast %258 : vector<8x32xf32> to vector<1x8x32xf32>
    tpu.vector_store %arg26[%c6, %c0_66, %c0_67], %261 {strides = array<i32>} : memref<8x8x32xf32, #tpu.memory_space<vmem>>, vector<1x8x32xf32>,
    %262 = vector.extract_strided_slice %32 {offsets = [7, 0, 0], sizes = [1, 8, 128], strides = [1, 1, 1]} : vector<8x8x128xf32> to vector<1x8x128xf32>
    %263 = vector.shape_cast %262 : vector<1x8x128xf32> to vector<8x128xf32>
    %cst_68 = arith.constant dense<0.000000e+00> : vector<8x128xf32>
    %264 = tpu.matmul %258, %33, %cst_68 {dimension_numbers = #tpu.dot_dimension_numbers<[1], [0], [0], [1], [0, 0, 1, 1], [], []>} : vector<8x32xf32>, vector<32x128xf32>, vector<8x128xf32> -> vector<8x128xf32>
    %265 = arith.addf %263, %264 : vector<8x128xf32>
    %266 = vector.extract_strided_slice %265 {offsets = [0, 0], sizes = [8, 32], strides = [1, 1]} : vector<8x128xf32> to vector<8x32xf32>
    %267 = arith.negf %266 : vector<8x32xf32>
    %268 = math.exp %267 : vector<8x32xf32>
    %cst_69 = arith.constant 1.000000e+00 : f32
    %269 = vector.broadcast %cst_69 : f32 to vector<8x32xf32>
    %270 = arith.addf %269, %268 : vector<8x32xf32>
    %271 = arith.divf %269, %270 : vector<8x32xf32>
    %272 = vector.extract_strided_slice %265 {offsets = [0, 32], sizes = [8, 32], strides = [1, 1]} : vector<8x128xf32> to vector<8x32xf32>
    %273 = arith.negf %272 : vector<8x32xf32>
    %274 = math.exp %273 : vector<8x32xf32>
    %cst_70 = arith.constant 1.000000e+00 : f32
    %275 = vector.broadcast %cst_70 : f32 to vector<8x32xf32>
    %276 = arith.addf %275, %274 : vector<8x32xf32>
    %277 = arith.divf %275, %276 : vector<8x32xf32>
    %278 = vector.extract_strided_slice %265 {offsets = [0, 64], sizes = [8, 32], strides = [1, 1]} : vector<8x128xf32> to vector<8x32xf32>
    %279 = math.tanh %278 : vector<8x32xf32>
    %280 = vector.extract_strided_slice %265 {offsets = [0, 96], sizes = [8, 32], strides = [1, 1]} : vector<8x128xf32> to vector<8x32xf32>
    %281 = arith.negf %280 : vector<8x32xf32>
    %282 = math.exp %281 : vector<8x32xf32>
    %cst_71 = arith.constant 1.000000e+00 : f32
    %283 = vector.broadcast %cst_71 : f32 to vector<8x32xf32>
    %284 = arith.addf %283, %282 : vector<8x32xf32>
    %285 = arith.divf %283, %284 : vector<8x32xf32>
    %286 = arith.mulf %277, %256 : vector<8x32xf32>
    %287 = arith.mulf %271, %279 : vector<8x32xf32>
    %288 = arith.addf %286, %287 : vector<8x32xf32>
    %289 = math.tanh %288 : vector<8x32xf32>
    %290 = arith.mulf %285, %289 : vector<8x32xf32>
    %c7 = arith.constant 7 : index
    %c0_72 = arith.constant 0 : index
    %c0_73 = arith.constant 0 : index
    %291 = vector.load %arg26[%c7, %c0_72, %c0_73] : memref<8x8x32xf32, #tpu.memory_space<vmem>>, vector<1x8x32xf32>
    %292 = vector.shape_cast %291 : vector<1x8x32xf32> to vector<8x32xf32>
    %293 = vector.shape_cast %290 : vector<8x32xf32> to vector<1x8x32xf32>
    tpu.vector_store %arg26[%c7, %c0_72, %c0_73], %293 {strides = array<i32>} : memref<8x8x32xf32, #tpu.memory_space<vmem>>, vector<1x8x32xf32>,
    %c0_74 = arith.constant 0 : index
    %c0_75 = arith.constant 0 : index
    %c0_76 = arith.constant 0 : index
    %294 = vector.load %arg26[%c0_74, %c0_75, %c0_76] : memref<8x8x32xf32, #tpu.memory_space<vmem>>, vector<8x8x32xf32>
    %295 = vector.shape_cast %294 : vector<8x8x32xf32> to vector<64x32xf32>
    %c0_77 = arith.constant 0 : index
    %c0_78 = arith.constant 0 : index
    %296 = vector.load %arg8[%c0_77, %c0_78] : memref<32x128xf32, #tpu.memory_space<vmem>>, vector<32x128xf32>
    %cst_79 = arith.constant dense<0.000000e+00> : vector<64x128xf32>
    %297 = tpu.matmul %295, %296, %cst_79 {dimension_numbers = #tpu.dot_dimension_numbers<[1], [0], [0], [1], [0, 0, 1, 1], [], []>} : vector<64x32xf32>, vector<32x128xf32>, vector<64x128xf32> -> vector<64x128xf32>
    %c0_80 = arith.constant 0 : index
    %c0_81 = arith.constant 0 : index
    %298 = vector.load %arg10[%c0_80, %c0_81] : memref<1x128xf32, #tpu.memory_space<vmem>>, vector<1x128xf32>
    %299 = vector.broadcast %298 : vector<1x128xf32> to vector<64x128xf32>
    %300 = arith.addf %297, %299 : vector<64x128xf32>
    %301 = vector.shape_cast %300 : vector<64x128xf32> to vector<8x8x128xf32>
    %c0_82 = arith.constant 0 : index
    %c0_83 = arith.constant 0 : index
    %302 = vector.load %arg9[%c0_82, %c0_83] : memref<32x128xf32, #tpu.memory_space<vmem>>, vector<32x128xf32>
    %c1_84 = arith.constant 1 : index
    %c0_85 = arith.constant 0 : index
    %c0_86 = arith.constant 0 : index
    %303 = vector.load %arg11[%c1_84, %c0_85, %c0_86] : memref<2x8x32xf32, #tpu.memory_space<vmem>>, vector<1x8x32xf32>
    %304 = vector.shape_cast %303 : vector<1x8x32xf32> to vector<8x32xf32>
    %c1_87 = arith.constant 1 : index
    %c0_88 = arith.constant 0 : index
    %c0_89 = arith.constant 0 : index
    %305 = vector.load %arg12[%c1_87, %c0_88, %c0_89] : memref<2x8x32xf32, #tpu.memory_space<vmem>>, vector<1x8x32xf32>
    %306 = vector.shape_cast %305 : vector<1x8x32xf32> to vector<8x32xf32>
    %307 = vector.extract_strided_slice %301 {offsets = [0, 0, 0], sizes = [1, 8, 128], strides = [1, 1, 1]} : vector<8x8x128xf32> to vector<1x8x128xf32>
    %308 = vector.shape_cast %307 : vector<1x8x128xf32> to vector<8x128xf32>
    %cst_90 = arith.constant dense<0.000000e+00> : vector<8x128xf32>
    %309 = tpu.matmul %304, %302, %cst_90 {dimension_numbers = #tpu.dot_dimension_numbers<[1], [0], [0], [1], [0, 0, 1, 1], [], []>} : vector<8x32xf32>, vector<32x128xf32>, vector<8x128xf32> -> vector<8x128xf32>
    %310 = arith.addf %308, %309 : vector<8x128xf32>
    %311 = vector.extract_strided_slice %310 {offsets = [0, 0], sizes = [8, 32], strides = [1, 1]} : vector<8x128xf32> to vector<8x32xf32>
    %312 = arith.negf %311 : vector<8x32xf32>
    %313 = math.exp %312 : vector<8x32xf32>
    %cst_91 = arith.constant 1.000000e+00 : f32
    %314 = vector.broadcast %cst_91 : f32 to vector<8x32xf32>
    %315 = arith.addf %314, %313 : vector<8x32xf32>
    %316 = arith.divf %314, %315 : vector<8x32xf32>
    %317 = vector.extract_strided_slice %310 {offsets = [0, 32], sizes = [8, 32], strides = [1, 1]} : vector<8x128xf32> to vector<8x32xf32>
    %318 = arith.negf %317 : vector<8x32xf32>
    %319 = math.exp %318 : vector<8x32xf32>
    %cst_92 = arith.constant 1.000000e+00 : f32
    %320 = vector.broadcast %cst_92 : f32 to vector<8x32xf32>
    %321 = arith.addf %320, %319 : vector<8x32xf32>
    %322 = arith.divf %320, %321 : vector<8x32xf32>
    %323 = vector.extract_strided_slice %310 {offsets = [0, 64], sizes = [8, 32], strides = [1, 1]} : vector<8x128xf32> to vector<8x32xf32>
    %324 = math.tanh %323 : vector<8x32xf32>
    %325 = vector.extract_strided_slice %310 {offsets = [0, 96], sizes = [8, 32], strides = [1, 1]} : vector<8x128xf32> to vector<8x32xf32>
    %326 = arith.negf %325 : vector<8x32xf32>
    %327 = math.exp %326 : vector<8x32xf32>
    %cst_93 = arith.constant 1.000000e+00 : f32
    %328 = vector.broadcast %cst_93 : f32 to vector<8x32xf32>
    %329 = arith.addf %328, %327 : vector<8x32xf32>
    %330 = arith.divf %328, %329 : vector<8x32xf32>
    %331 = arith.mulf %322, %306 : vector<8x32xf32>
    %332 = arith.mulf %316, %324 : vector<8x32xf32>
    %333 = arith.addf %331, %332 : vector<8x32xf32>
    %334 = math.tanh %333 : vector<8x32xf32>
    %335 = arith.mulf %330, %334 : vector<8x32xf32>
    %336 = vector.extract_strided_slice %301 {offsets = [1, 0, 0], sizes = [1, 8, 128], strides = [1, 1, 1]} : vector<8x8x128xf32> to vector<1x8x128xf32>
    %337 = vector.shape_cast %336 : vector<1x8x128xf32> to vector<8x128xf32>
    %cst_94 = arith.constant dense<0.000000e+00> : vector<8x128xf32>
    %338 = tpu.matmul %335, %302, %cst_94 {dimension_numbers = #tpu.dot_dimension_numbers<[1], [0], [0], [1], [0, 0, 1, 1], [], []>} : vector<8x32xf32>, vector<32x128xf32>, vector<8x128xf32> -> vector<8x128xf32>
    %339 = arith.addf %337, %338 : vector<8x128xf32>
    %340 = vector.extract_strided_slice %339 {offsets = [0, 0], sizes = [8, 32], strides = [1, 1]} : vector<8x128xf32> to vector<8x32xf32>
    %341 = arith.negf %340 : vector<8x32xf32>
    %342 = math.exp %341 : vector<8x32xf32>
    %cst_95 = arith.constant 1.000000e+00 : f32
    %343 = vector.broadcast %cst_95 : f32 to vector<8x32xf32>
    %344 = arith.addf %343, %342 : vector<8x32xf32>
    %345 = arith.divf %343, %344 : vector<8x32xf32>
    %346 = vector.extract_strided_slice %339 {offsets = [0, 32], sizes = [8, 32], strides = [1, 1]} : vector<8x128xf32> to vector<8x32xf32>
    %347 = arith.negf %346 : vector<8x32xf32>
    %348 = math.exp %347 : vector<8x32xf32>
    %cst_96 = arith.constant 1.000000e+00 : f32
    %349 = vector.broadcast %cst_96 : f32 to vector<8x32xf32>
    %350 = arith.addf %349, %348 : vector<8x32xf32>
    %351 = arith.divf %349, %350 : vector<8x32xf32>
    %352 = vector.extract_strided_slice %339 {offsets = [0, 64], sizes = [8, 32], strides = [1, 1]} : vector<8x128xf32> to vector<8x32xf32>
    %353 = math.tanh %352 : vector<8x32xf32>
    %354 = vector.extract_strided_slice %339 {offsets = [0, 96], sizes = [8, 32], strides = [1, 1]} : vector<8x128xf32> to vector<8x32xf32>
    %355 = arith.negf %354 : vector<8x32xf32>
    %356 = math.exp %355 : vector<8x32xf32>
    %cst_97 = arith.constant 1.000000e+00 : f32
    %357 = vector.broadcast %cst_97 : f32 to vector<8x32xf32>
    %358 = arith.addf %357, %356 : vector<8x32xf32>
    %359 = arith.divf %357, %358 : vector<8x32xf32>
    %360 = arith.mulf %351, %333 : vector<8x32xf32>
    %361 = arith.mulf %345, %353 : vector<8x32xf32>
    %362 = arith.addf %360, %361 : vector<8x32xf32>
    %363 = math.tanh %362 : vector<8x32xf32>
    %364 = arith.mulf %359, %363 : vector<8x32xf32>
    %365 = vector.extract_strided_slice %301 {offsets = [2, 0, 0], sizes = [1, 8, 128], strides = [1, 1, 1]} : vector<8x8x128xf32> to vector<1x8x128xf32>
    %366 = vector.shape_cast %365 : vector<1x8x128xf32> to vector<8x128xf32>
    %cst_98 = arith.constant dense<0.000000e+00> : vector<8x128xf32>
    %367 = tpu.matmul %364, %302, %cst_98 {dimension_numbers = #tpu.dot_dimension_numbers<[1], [0], [0], [1], [0, 0, 1, 1], [], []>} : vector<8x32xf32>, vector<32x128xf32>, vector<8x128xf32> -> vector<8x128xf32>
    %368 = arith.addf %366, %367 : vector<8x128xf32>
    %369 = vector.extract_strided_slice %368 {offsets = [0, 0], sizes = [8, 32], strides = [1, 1]} : vector<8x128xf32> to vector<8x32xf32>
    %370 = arith.negf %369 : vector<8x32xf32>
    %371 = math.exp %370 : vector<8x32xf32>
    %cst_99 = arith.constant 1.000000e+00 : f32
    %372 = vector.broadcast %cst_99 : f32 to vector<8x32xf32>
    %373 = arith.addf %372, %371 : vector<8x32xf32>
    %374 = arith.divf %372, %373 : vector<8x32xf32>
    %375 = vector.extract_strided_slice %368 {offsets = [0, 32], sizes = [8, 32], strides = [1, 1]} : vector<8x128xf32> to vector<8x32xf32>
    %376 = arith.negf %375 : vector<8x32xf32>
    %377 = math.exp %376 : vector<8x32xf32>
    %cst_100 = arith.constant 1.000000e+00 : f32
    %378 = vector.broadcast %cst_100 : f32 to vector<8x32xf32>
    %379 = arith.addf %378, %377 : vector<8x32xf32>
    %380 = arith.divf %378, %379 : vector<8x32xf32>
    %381 = vector.extract_strided_slice %368 {offsets = [0, 64], sizes = [8, 32], strides = [1, 1]} : vector<8x128xf32> to vector<8x32xf32>
    %382 = math.tanh %381 : vector<8x32xf32>
    %383 = vector.extract_strided_slice %368 {offsets = [0, 96], sizes = [8, 32], strides = [1, 1]} : vector<8x128xf32> to vector<8x32xf32>
    %384 = arith.negf %383 : vector<8x32xf32>
    %385 = math.exp %384 : vector<8x32xf32>
    %cst_101 = arith.constant 1.000000e+00 : f32
    %386 = vector.broadcast %cst_101 : f32 to vector<8x32xf32>
    %387 = arith.addf %386, %385 : vector<8x32xf32>
    %388 = arith.divf %386, %387 : vector<8x32xf32>
    %389 = arith.mulf %380, %362 : vector<8x32xf32>
    %390 = arith.mulf %374, %382 : vector<8x32xf32>
    %391 = arith.addf %389, %390 : vector<8x32xf32>
    %392 = math.tanh %391 : vector<8x32xf32>
    %393 = arith.mulf %388, %392 : vector<8x32xf32>
    %394 = vector.extract_strided_slice %301 {offsets = [3, 0, 0], sizes = [1, 8, 128], strides = [1, 1, 1]} : vector<8x8x128xf32> to vector<1x8x128xf32>
    %395 = vector.shape_cast %394 : vector<1x8x128xf32> to vector<8x128xf32>
    %cst_102 = arith.constant dense<0.000000e+00> : vector<8x128xf32>
    %396 = tpu.matmul %393, %302, %cst_102 {dimension_numbers = #tpu.dot_dimension_numbers<[1], [0], [0], [1], [0, 0, 1, 1], [], []>} : vector<8x32xf32>, vector<32x128xf32>, vector<8x128xf32> -> vector<8x128xf32>
    %397 = arith.addf %395, %396 : vector<8x128xf32>
    %398 = vector.extract_strided_slice %397 {offsets = [0, 0], sizes = [8, 32], strides = [1, 1]} : vector<8x128xf32> to vector<8x32xf32>
    %399 = arith.negf %398 : vector<8x32xf32>
    %400 = math.exp %399 : vector<8x32xf32>
    %cst_103 = arith.constant 1.000000e+00 : f32
    %401 = vector.broadcast %cst_103 : f32 to vector<8x32xf32>
    %402 = arith.addf %401, %400 : vector<8x32xf32>
    %403 = arith.divf %401, %402 : vector<8x32xf32>
    %404 = vector.extract_strided_slice %397 {offsets = [0, 32], sizes = [8, 32], strides = [1, 1]} : vector<8x128xf32> to vector<8x32xf32>
    %405 = arith.negf %404 : vector<8x32xf32>
    %406 = math.exp %405 : vector<8x32xf32>
    %cst_104 = arith.constant 1.000000e+00 : f32
    %407 = vector.broadcast %cst_104 : f32 to vector<8x32xf32>
    %408 = arith.addf %407, %406 : vector<8x32xf32>
    %409 = arith.divf %407, %408 : vector<8x32xf32>
    %410 = vector.extract_strided_slice %397 {offsets = [0, 64], sizes = [8, 32], strides = [1, 1]} : vector<8x128xf32> to vector<8x32xf32>
    %411 = math.tanh %410 : vector<8x32xf32>
    %412 = vector.extract_strided_slice %397 {offsets = [0, 96], sizes = [8, 32], strides = [1, 1]} : vector<8x128xf32> to vector<8x32xf32>
    %413 = arith.negf %412 : vector<8x32xf32>
    %414 = math.exp %413 : vector<8x32xf32>
    %cst_105 = arith.constant 1.000000e+00 : f32
    %415 = vector.broadcast %cst_105 : f32 to vector<8x32xf32>
    %416 = arith.addf %415, %414 : vector<8x32xf32>
    %417 = arith.divf %415, %416 : vector<8x32xf32>
    %418 = arith.mulf %409, %391 : vector<8x32xf32>
    %419 = arith.mulf %403, %411 : vector<8x32xf32>
    %420 = arith.addf %418, %419 : vector<8x32xf32>
    %421 = math.tanh %420 : vector<8x32xf32>
    %422 = arith.mulf %417, %421 : vector<8x32xf32>
    %423 = vector.extract_strided_slice %301 {offsets = [4, 0, 0], sizes = [1, 8, 128], strides = [1, 1, 1]} : vector<8x8x128xf32> to vector<1x8x128xf32>
    %424 = vector.shape_cast %423 : vector<1x8x128xf32> to vector<8x128xf32>
    %cst_106 = arith.constant dense<0.000000e+00> : vector<8x128xf32>
    %425 = tpu.matmul %422, %302, %cst_106 {dimension_numbers = #tpu.dot_dimension_numbers<[1], [0], [0], [1], [0, 0, 1, 1], [], []>} : vector<8x32xf32>, vector<32x128xf32>, vector<8x128xf32> -> vector<8x128xf32>
    %426 = arith.addf %424, %425 : vector<8x128xf32>
    %427 = vector.extract_strided_slice %426 {offsets = [0, 0], sizes = [8, 32], strides = [1, 1]} : vector<8x128xf32> to vector<8x32xf32>
    %428 = arith.negf %427 : vector<8x32xf32>
    %429 = math.exp %428 : vector<8x32xf32>
    %cst_107 = arith.constant 1.000000e+00 : f32
    %430 = vector.broadcast %cst_107 : f32 to vector<8x32xf32>
    %431 = arith.addf %430, %429 : vector<8x32xf32>
    %432 = arith.divf %430, %431 : vector<8x32xf32>
    %433 = vector.extract_strided_slice %426 {offsets = [0, 32], sizes = [8, 32], strides = [1, 1]} : vector<8x128xf32> to vector<8x32xf32>
    %434 = arith.negf %433 : vector<8x32xf32>
    %435 = math.exp %434 : vector<8x32xf32>
    %cst_108 = arith.constant 1.000000e+00 : f32
    %436 = vector.broadcast %cst_108 : f32 to vector<8x32xf32>
    %437 = arith.addf %436, %435 : vector<8x32xf32>
    %438 = arith.divf %436, %437 : vector<8x32xf32>
    %439 = vector.extract_strided_slice %426 {offsets = [0, 64], sizes = [8, 32], strides = [1, 1]} : vector<8x128xf32> to vector<8x32xf32>
    %440 = math.tanh %439 : vector<8x32xf32>
    %441 = vector.extract_strided_slice %426 {offsets = [0, 96], sizes = [8, 32], strides = [1, 1]} : vector<8x128xf32> to vector<8x32xf32>
    %442 = arith.negf %441 : vector<8x32xf32>
    %443 = math.exp %442 : vector<8x32xf32>
    %cst_109 = arith.constant 1.000000e+00 : f32
    %444 = vector.broadcast %cst_109 : f32 to vector<8x32xf32>
    %445 = arith.addf %444, %443 : vector<8x32xf32>
    %446 = arith.divf %444, %445 : vector<8x32xf32>
    %447 = arith.mulf %438, %420 : vector<8x32xf32>
    %448 = arith.mulf %432, %440 : vector<8x32xf32>
    %449 = arith.addf %447, %448 : vector<8x32xf32>
    %450 = math.tanh %449 : vector<8x32xf32>
    %451 = arith.mulf %446, %450 : vector<8x32xf32>
    %452 = vector.extract_strided_slice %301 {offsets = [5, 0, 0], sizes = [1, 8, 128], strides = [1, 1, 1]} : vector<8x8x128xf32> to vector<1x8x128xf32>
    %453 = vector.shape_cast %452 : vector<1x8x128xf32> to vector<8x128xf32>
    %cst_110 = arith.constant dense<0.000000e+00> : vector<8x128xf32>
    %454 = tpu.matmul %451, %302, %cst_110 {dimension_numbers = #tpu.dot_dimension_numbers<[1], [0], [0], [1], [0, 0, 1, 1], [], []>} : vector<8x32xf32>, vector<32x128xf32>, vector<8x128xf32> -> vector<8x128xf32>
    %455 = arith.addf %453, %454 : vector<8x128xf32>
    %456 = vector.extract_strided_slice %455 {offsets = [0, 0], sizes = [8, 32], strides = [1, 1]} : vector<8x128xf32> to vector<8x32xf32>
    %457 = arith.negf %456 : vector<8x32xf32>
    %458 = math.exp %457 : vector<8x32xf32>
    %cst_111 = arith.constant 1.000000e+00 : f32
    %459 = vector.broadcast %cst_111 : f32 to vector<8x32xf32>
    %460 = arith.addf %459, %458 : vector<8x32xf32>
    %461 = arith.divf %459, %460 : vector<8x32xf32>
    %462 = vector.extract_strided_slice %455 {offsets = [0, 32], sizes = [8, 32], strides = [1, 1]} : vector<8x128xf32> to vector<8x32xf32>
    %463 = arith.negf %462 : vector<8x32xf32>
    %464 = math.exp %463 : vector<8x32xf32>
    %cst_112 = arith.constant 1.000000e+00 : f32
    %465 = vector.broadcast %cst_112 : f32 to vector<8x32xf32>
    %466 = arith.addf %465, %464 : vector<8x32xf32>
    %467 = arith.divf %465, %466 : vector<8x32xf32>
    %468 = vector.extract_strided_slice %455 {offsets = [0, 64], sizes = [8, 32], strides = [1, 1]} : vector<8x128xf32> to vector<8x32xf32>
    %469 = math.tanh %468 : vector<8x32xf32>
    %470 = vector.extract_strided_slice %455 {offsets = [0, 96], sizes = [8, 32], strides = [1, 1]} : vector<8x128xf32> to vector<8x32xf32>
    %471 = arith.negf %470 : vector<8x32xf32>
    %472 = math.exp %471 : vector<8x32xf32>
    %cst_113 = arith.constant 1.000000e+00 : f32
    %473 = vector.broadcast %cst_113 : f32 to vector<8x32xf32>
    %474 = arith.addf %473, %472 : vector<8x32xf32>
    %475 = arith.divf %473, %474 : vector<8x32xf32>
    %476 = arith.mulf %467, %449 : vector<8x32xf32>
    %477 = arith.mulf %461, %469 : vector<8x32xf32>
    %478 = arith.addf %476, %477 : vector<8x32xf32>
    %479 = math.tanh %478 : vector<8x32xf32>
    %480 = arith.mulf %475, %479 : vector<8x32xf32>
    %481 = vector.extract_strided_slice %301 {offsets = [6, 0, 0], sizes = [1, 8, 128], strides = [1, 1, 1]} : vector<8x8x128xf32> to vector<1x8x128xf32>
    %482 = vector.shape_cast %481 : vector<1x8x128xf32> to vector<8x128xf32>
    %cst_114 = arith.constant dense<0.000000e+00> : vector<8x128xf32>
    %483 = tpu.matmul %480, %302, %cst_114 {dimension_numbers = #tpu.dot_dimension_numbers<[1], [0], [0], [1], [0, 0, 1, 1], [], []>} : vector<8x32xf32>, vector<32x128xf32>, vector<8x128xf32> -> vector<8x128xf32>
    %484 = arith.addf %482, %483 : vector<8x128xf32>
    %485 = vector.extract_strided_slice %484 {offsets = [0, 0], sizes = [8, 32], strides = [1, 1]} : vector<8x128xf32> to vector<8x32xf32>
    %486 = arith.negf %485 : vector<8x32xf32>
    %487 = math.exp %486 : vector<8x32xf32>
    %cst_115 = arith.constant 1.000000e+00 : f32
    %488 = vector.broadcast %cst_115 : f32 to vector<8x32xf32>
    %489 = arith.addf %488, %487 : vector<8x32xf32>
    %490 = arith.divf %488, %489 : vector<8x32xf32>
    %491 = vector.extract_strided_slice %484 {offsets = [0, 32], sizes = [8, 32], strides = [1, 1]} : vector<8x128xf32> to vector<8x32xf32>
    %492 = arith.negf %491 : vector<8x32xf32>
    %493 = math.exp %492 : vector<8x32xf32>
    %cst_116 = arith.constant 1.000000e+00 : f32
    %494 = vector.broadcast %cst_116 : f32 to vector<8x32xf32>
    %495 = arith.addf %494, %493 : vector<8x32xf32>
    %496 = arith.divf %494, %495 : vector<8x32xf32>
    %497 = vector.extract_strided_slice %484 {offsets = [0, 64], sizes = [8, 32], strides = [1, 1]} : vector<8x128xf32> to vector<8x32xf32>
    %498 = math.tanh %497 : vector<8x32xf32>
    %499 = vector.extract_strided_slice %484 {offsets = [0, 96], sizes = [8, 32], strides = [1, 1]} : vector<8x128xf32> to vector<8x32xf32>
    %500 = arith.negf %499 : vector<8x32xf32>
    %501 = math.exp %500 : vector<8x32xf32>
    %cst_117 = arith.constant 1.000000e+00 : f32
    %502 = vector.broadcast %cst_117 : f32 to vector<8x32xf32>
    %503 = arith.addf %502, %501 : vector<8x32xf32>
    %504 = arith.divf %502, %503 : vector<8x32xf32>
    %505 = arith.mulf %496, %478 : vector<8x32xf32>
    %506 = arith.mulf %490, %498 : vector<8x32xf32>
    %507 = arith.addf %505, %506 : vector<8x32xf32>
    %508 = math.tanh %507 : vector<8x32xf32>
    %509 = arith.mulf %504, %508 : vector<8x32xf32>
    %510 = vector.extract_strided_slice %301 {offsets = [7, 0, 0], sizes = [1, 8, 128], strides = [1, 1, 1]} : vector<8x8x128xf32> to vector<1x8x128xf32>
    %511 = vector.shape_cast %510 : vector<1x8x128xf32> to vector<8x128xf32>
    %cst_118 = arith.constant dense<0.000000e+00> : vector<8x128xf32>
    %512 = tpu.matmul %509, %302, %cst_118 {dimension_numbers = #tpu.dot_dimension_numbers<[1], [0], [0], [1], [0, 0, 1, 1], [], []>} : vector<8x32xf32>, vector<32x128xf32>, vector<8x128xf32> -> vector<8x128xf32>
    %513 = arith.addf %511, %512 : vector<8x128xf32>
    %514 = vector.extract_strided_slice %513 {offsets = [0, 0], sizes = [8, 32], strides = [1, 1]} : vector<8x128xf32> to vector<8x32xf32>
    %515 = arith.negf %514 : vector<8x32xf32>
    %516 = math.exp %515 : vector<8x32xf32>
    %cst_119 = arith.constant 1.000000e+00 : f32
    %517 = vector.broadcast %cst_119 : f32 to vector<8x32xf32>
    %518 = arith.addf %517, %516 : vector<8x32xf32>
    %519 = arith.divf %517, %518 : vector<8x32xf32>
    %520 = vector.extract_strided_slice %513 {offsets = [0, 32], sizes = [8, 32], strides = [1, 1]} : vector<8x128xf32> to vector<8x32xf32>
    %521 = arith.negf %520 : vector<8x32xf32>
    %522 = math.exp %521 : vector<8x32xf32>
    %cst_120 = arith.constant 1.000000e+00 : f32
    %523 = vector.broadcast %cst_120 : f32 to vector<8x32xf32>
    %524 = arith.addf %523, %522 : vector<8x32xf32>
    %525 = arith.divf %523, %524 : vector<8x32xf32>
    %526 = vector.extract_strided_slice %513 {offsets = [0, 64], sizes = [8, 32], strides = [1, 1]} : vector<8x128xf32> to vector<8x32xf32>
    %527 = math.tanh %526 : vector<8x32xf32>
    %528 = vector.extract_strided_slice %513 {offsets = [0, 96], sizes = [8, 32], strides = [1, 1]} : vector<8x128xf32> to vector<8x32xf32>
    %529 = arith.negf %528 : vector<8x32xf32>
    %530 = math.exp %529 : vector<8x32xf32>
    %cst_121 = arith.constant 1.000000e+00 : f32
    %531 = vector.broadcast %cst_121 : f32 to vector<8x32xf32>
    %532 = arith.addf %531, %530 : vector<8x32xf32>
    %533 = arith.divf %531, %532 : vector<8x32xf32>
    %534 = arith.mulf %525, %507 : vector<8x32xf32>
    %535 = arith.mulf %519, %527 : vector<8x32xf32>
    %536 = arith.addf %534, %535 : vector<8x32xf32>
    %537 = math.tanh %536 : vector<8x32xf32>
    %538 = arith.mulf %533, %537 : vector<8x32xf32>
    %c0_122 = arith.constant 0 : index
    %c0_123 = arith.constant 0 : index
    %539 = vector.load %arg0[%c0_122, %c0_123] : memref<8x7xf32, #tpu.memory_space<vmem>>, vector<8x7xf32>
    %c0_124 = arith.constant 0 : index
    %c0_125 = arith.constant 0 : index
    %540 = vector.load %arg13[%c0_124, %c0_125] : memref<7x32xf32, #tpu.memory_space<vmem>>, vector<7x32xf32>
    %cst_126 = arith.constant dense<0.000000e+00> : vector<8x32xf32>
    %541 = tpu.matmul %539, %540, %cst_126 {dimension_numbers = #tpu.dot_dimension_numbers<[1], [0], [0], [1], [0, 0, 1, 1], [], []>} : vector<8x7xf32>, vector<7x32xf32>, vector<8x32xf32> -> vector<8x32xf32>
    %c0_127 = arith.constant 0 : index
    %c0_128 = arith.constant 0 : index
    %542 = vector.load %arg14[%c0_127, %c0_128] : memref<5x32xf32, #tpu.memory_space<vmem>>, vector<5x32xf32>
    %cst_129 = arith.constant dense<0.000000e+00> : vector<8x32xf32>
    %543 = tpu.matmul %24, %542, %cst_129 {dimension_numbers = #tpu.dot_dimension_numbers<[1], [0], [0], [1], [0, 0, 1, 1], [], []>} : vector<8x5xf32>, vector<5x32xf32>, vector<8x32xf32> -> vector<8x32xf32>
    %544 = arith.addf %541, %543 : vector<8x32xf32>
    %c0_130 = arith.constant 0 : index
    %c0_131 = arith.constant 0 : index
    %545 = vector.load %arg15[%c0_130, %c0_131] : memref<32x32xf32, #tpu.memory_space<vmem>>, vector<32x32xf32>
    %cst_132 = arith.constant dense<0.000000e+00> : vector<8x32xf32>
    %546 = tpu.matmul %538, %545, %cst_132 {dimension_numbers = #tpu.dot_dimension_numbers<[1], [0], [0], [1], [0, 0, 1, 1], [], []>} : vector<8x32xf32>, vector<32x32xf32>, vector<8x32xf32> -> vector<8x32xf32>
    %547 = arith.addf %544, %546 : vector<8x32xf32>
    %c0_133 = arith.constant 0 : index
    %c0_134 = arith.constant 0 : index
    %548 = vector.load %arg16[%c0_133, %c0_134] : memref<1x32xf32, #tpu.memory_space<vmem>>, vector<1x32xf32>
    %549 = vector.broadcast %548 : vector<1x32xf32> to vector<8x32xf32>
    %550 = arith.addf %547, %549 : vector<8x32xf32>
    %cst_135 = arith.constant 0.000000e+00 : f32
    %551 = vector.broadcast %cst_135 : f32 to vector<8x32xf32>
    %552 = arith.maximumf %550, %551 : vector<8x32xf32>
    %cst_136 = arith.constant dense<0.000000e+00> : vector<32xf32>
    %553 = vector.multi_reduction <add>, %552, %cst_136 [0] : vector<8x32xf32> to vector<32xf32>
    %554 = vector.shape_cast %553 : vector<32xf32> to vector<1x32xf32>
    %cst_137 = arith.constant 8.000000e+00 : f32
    %555 = vector.broadcast %cst_137 : f32 to vector<1x32xf32>
    %556 = arith.divf %554, %555 : vector<1x32xf32>
    %557 = vector.broadcast %556 : vector<1x32xf32> to vector<8x32xf32>
    %558 = arith.subf %552, %557 : vector<8x32xf32>
    %559 = arith.mulf %558, %558 : vector<8x32xf32>
    %cst_138 = arith.constant dense<0.000000e+00> : vector<32xf32>
    %560 = vector.multi_reduction <add>, %559, %cst_138 [0] : vector<8x32xf32> to vector<32xf32>
    %561 = vector.shape_cast %560 : vector<32xf32> to vector<1x32xf32>
    %cst_139 = arith.constant 8.000000e+00 : f32
    %562 = vector.broadcast %cst_139 : f32 to vector<1x32xf32>
    %563 = arith.divf %561, %562 : vector<1x32xf32>
    %564 = vector.broadcast %556 : vector<1x32xf32> to vector<8x32xf32>
    %565 = arith.subf %552, %564 : vector<8x32xf32>
    %cst_140 = arith.constant 9.99999974E-6 : f32
    %566 = vector.broadcast %cst_140 : f32 to vector<1x32xf32>
    %567 = arith.addf %563, %566 : vector<1x32xf32>
    %568 = math.rsqrt %567 : vector<1x32xf32>
    %569 = vector.broadcast %568 : vector<1x32xf32> to vector<8x32xf32>
    %570 = arith.mulf %565, %569 : vector<8x32xf32>
    %c0_141 = arith.constant 0 : index
    %c0_142 = arith.constant 0 : index
    %571 = vector.load %arg17[%c0_141, %c0_142] : memref<1x32xf32, #tpu.memory_space<vmem>>, vector<1x32xf32>
    %572 = vector.broadcast %571 : vector<1x32xf32> to vector<8x32xf32>
    %573 = arith.mulf %570, %572 : vector<8x32xf32>
    %c0_143 = arith.constant 0 : index
    %c0_144 = arith.constant 0 : index
    %574 = vector.load %arg18[%c0_143, %c0_144] : memref<1x32xf32, #tpu.memory_space<vmem>>, vector<1x32xf32>
    %575 = vector.broadcast %574 : vector<1x32xf32> to vector<8x32xf32>
    %576 = arith.addf %573, %575 : vector<8x32xf32>
    %c0_145 = arith.constant 0 : index
    %c0_146 = arith.constant 0 : index
    %577 = vector.load %arg19[%c0_145, %c0_146] : memref<32x16xf32, #tpu.memory_space<vmem>>, vector<32x16xf32>
    %cst_147 = arith.constant dense<0.000000e+00> : vector<8x16xf32>
    %578 = tpu.matmul %576, %577, %cst_147 {dimension_numbers = #tpu.dot_dimension_numbers<[1], [0], [0], [1], [0, 0, 1, 1], [], []>} : vector<8x32xf32>, vector<32x16xf32>, vector<8x16xf32> -> vector<8x16xf32>
    %c0_148 = arith.constant 0 : index
    %c0_149 = arith.constant 0 : index
    %579 = vector.load %arg20[%c0_148, %c0_149] : memref<1x16xf32, #tpu.memory_space<vmem>>, vector<1x16xf32>
    %580 = vector.broadcast %579 : vector<1x16xf32> to vector<8x16xf32>
    %581 = arith.addf %578, %580 : vector<8x16xf32>
    %cst_150 = arith.constant 0.000000e+00 : f32
    %582 = vector.broadcast %cst_150 : f32 to vector<8x16xf32>
    %583 = arith.maximumf %581, %582 : vector<8x16xf32>
    %cst_151 = arith.constant dense<0.000000e+00> : vector<16xf32>
    %584 = vector.multi_reduction <add>, %583, %cst_151 [0] : vector<8x16xf32> to vector<16xf32>
    %585 = vector.shape_cast %584 : vector<16xf32> to vector<1x16xf32>
    %cst_152 = arith.constant 8.000000e+00 : f32
    %586 = vector.broadcast %cst_152 : f32 to vector<1x16xf32>
    %587 = arith.divf %585, %586 : vector<1x16xf32>
    %588 = vector.broadcast %587 : vector<1x16xf32> to vector<8x16xf32>
    %589 = arith.subf %583, %588 : vector<8x16xf32>
    %590 = arith.mulf %589, %589 : vector<8x16xf32>
    %cst_153 = arith.constant dense<0.000000e+00> : vector<16xf32>
    %591 = vector.multi_reduction <add>, %590, %cst_153 [0] : vector<8x16xf32> to vector<16xf32>
    %592 = vector.shape_cast %591 : vector<16xf32> to vector<1x16xf32>
    %cst_154 = arith.constant 8.000000e+00 : f32
    %593 = vector.broadcast %cst_154 : f32 to vector<1x16xf32>
    %594 = arith.divf %592, %593 : vector<1x16xf32>
    %595 = vector.broadcast %587 : vector<1x16xf32> to vector<8x16xf32>
    %596 = arith.subf %583, %595 : vector<8x16xf32>
    %cst_155 = arith.constant 9.99999974E-6 : f32
    %597 = vector.broadcast %cst_155 : f32 to vector<1x16xf32>
    %598 = arith.addf %594, %597 : vector<1x16xf32>
    %599 = math.rsqrt %598 : vector<1x16xf32>
    %600 = vector.broadcast %599 : vector<1x16xf32> to vector<8x16xf32>
    %601 = arith.mulf %596, %600 : vector<8x16xf32>
    %c0_156 = arith.constant 0 : index
    %c0_157 = arith.constant 0 : index
    %602 = vector.load %arg21[%c0_156, %c0_157] : memref<1x16xf32, #tpu.memory_space<vmem>>, vector<1x16xf32>
    %603 = vector.broadcast %602 : vector<1x16xf32> to vector<8x16xf32>
    %604 = arith.mulf %601, %603 : vector<8x16xf32>
    %c0_158 = arith.constant 0 : index
    %c0_159 = arith.constant 0 : index
    %605 = vector.load %arg22[%c0_158, %c0_159] : memref<1x16xf32, #tpu.memory_space<vmem>>, vector<1x16xf32>
    %606 = vector.broadcast %605 : vector<1x16xf32> to vector<8x16xf32>
    %607 = arith.addf %604, %606 : vector<8x16xf32>
    %c0_160 = arith.constant 0 : index
    %c0_161 = arith.constant 0 : index
    %608 = vector.load %arg23[%c0_160, %c0_161] : memref<16x1xf32, #tpu.memory_space<vmem>>, vector<16x1xf32>
    %cst_162 = arith.constant dense<0.000000e+00> : vector<8x1xf32>
    %609 = tpu.matmul %607, %608, %cst_162 {dimension_numbers = #tpu.dot_dimension_numbers<[1], [0], [0], [1], [0, 0, 1, 1], [], []>} : vector<8x16xf32>, vector<16x1xf32>, vector<8x1xf32> -> vector<8x1xf32>
    %c0_163 = arith.constant 0 : index
    %c0_164 = arith.constant 0 : index
    %610 = vector.load %arg24[%c0_163, %c0_164] : memref<1x1xf32, #tpu.memory_space<vmem>>, vector<1x1xf32>
    %611 = vector.broadcast %610 : vector<1x1xf32> to vector<8x1xf32>
    %612 = arith.addf %609, %611 : vector<8x1xf32>
    %c0_165 = arith.constant 0 : index
    %c0_166 = arith.constant 0 : index
    %613 = vector.load %arg25[%c0_165, %c0_166] : memref<8x1xf32, #tpu.memory_space<vmem>>, vector<8x1xf32>
    tpu.vector_store %arg25[%c0_165, %c0_166], %612 {strides = array<i32>} : memref<8x1xf32, #tpu.memory_space<vmem>>, vector<8x1xf32>,
    return
  }
}

</mosaic_0001>

<bundles_post_ra>
// kernel: structured_net_forward.1
= control target key start
LH: loop header
LB: loop body
LE: loop exit
PB: predicated region body
PF: predicated region fallthrough
CT: control target
= control target key end

     0   :  { %vm138_vm0 = vcmask 64512   ;;  %v3249_v0 = vmov 0.0|0.0   ;;  %vm3250_vm1 = vmmov 0   ;;  %v3251_v4 = vmov 0.0   ;;  %s3836_s6 = inlined_call_operand.vmem [shape: f32[32,128], index: 6, kind: input, shape index: {}]   ;;  %s3837_s5 = inlined_call_operand.vmem [shape: f32[8,128], index: 5, kind: input, shape index: {}]   ;;  %s3838_s4 = inlined_call_operand.vmem [shape: f32[8,8,8], index: 4, kind: input, shape index: {}]   ;;  %s3839_s11 = inlined_call_operand.vmem [shape: f32[2,8,32], index: 11, kind: input, shape index: {}]   ;;  %s3840_s7 = inlined_call_operand.vmem [shape: f32[1,128], index: 7, kind: input, shape index: {}]   ;;  %s3841_s12 = inlined_call_operand.vmem [shape: f32[2,8,32], index: 12, kind: input, shape index: {}]   ;;  %s3842_s8 = inlined_call_operand.vmem [shape: f32[32,128], index: 8, kind: input, shape index: {}]   ;;  %s3843_s9 = inlined_call_operand.vmem [shape: f32[32,128], index: 9, kind: input, shape index: {}]   ;;  %s3844_s10 = inlined_call_operand.vmem [shape: f32[1,128], index: 10, kind: input, shape index: {}]   ;;  %s3845_s14 = inlined_call_operand.vmem [shape: f32[5,32], index: 14, kind: input, shape index: {}]   ;;  %s3846_s1 = inlined_call_operand.vmem [shape: f32[8,5], index: 1, kind: input, shape index: {}]   ;;  %s3847_s15 = inlined_call_operand.vmem [shape: f32[32,32], index: 15, kind: input, shape index: {}]   ;;  %s3848_s2 = inlined_call_operand.vmem [shape: f32[1,5], index: 2, kind: input, shape index: {}]   ;;  %s3849_s3 = inlined_call_operand.vmem [shape: f32[1,5], index: 3, kind: input, shape index: {}]   ;;  %s3850_s13 = inlined_call_operand.vmem [shape: f32[7,32], index: 13, kind: input, shape index: {}]   ;;  %s3851_s0 = inlined_call_operand.vmem [shape: f32[8,7], index: 0, kind: input, shape index: {}]   ;;  %s3852_s19 = inlined_call_operand.vmem [shape: f32[32,16], index: 19, kind: input, shape index: {}]   ;;  %s3853_s16 = inlined_call_operand.vmem [shape: f32[1,32], index: 16, kind: input, shape index: {}]   ;;  %s3854_s17 = inlined_call_operand.vmem [shape: f32[1,32], index: 17, kind: input, shape index: {}]   ;;  %s3855_s18 = inlined_call_operand.vmem [shape: f32[1,32], index: 18, kind: input, shape index: {}]   ;;  %s3856_s23 = inlined_call_operand.vmem [shape: f32[16,1], index: 23, kind: input, shape index: {}]   ;;  %s3857_s24 = inlined_call_operand.<no memory space> [shape: f32[1,1], index: 24, kind: input, shape index: {}]   ;;  %s3858_s20 = inlined_call_operand.vmem [shape: f32[1,16], index: 20, kind: input, shape index: {}]   ;;  %s3859_s21 = inlined_call_operand.vmem [shape: f32[1,16], index: 21, kind: input, shape index: {}]   ;;  %s3860_s22 = inlined_call_operand.vmem [shape: f32[1,16], index: 22, kind: input, shape index: {}]   ;;  %s3861_s25 = inlined_call_operand.vmem [shape: f32[8,1], index: 25, kind: output, shape index: {}]  }
   0x1   :  { %3868 = sst [smem:[#allocation4_spill]] %s3836_s6  ;;  %2991 = vmatprep.subr.bf16.mxu1 %v3249_v0  ;;  %2764 = vmatprep.mubr.msk.f32.mxu1 %vm3250_vm1, %v3251_v4  ;;  %vm274_vm2 = vcmask 261120   ;;  %vm2067_vm3 = vcmask 1044480   ;;  %vm83_vm4 = vcmask 39936   ;;  %vm2145_vm5 = vcmask 1046528  }
   0x2   :  { %3869 = sst [smem:[#allocation5_spill]] %s3837_s5  ;;  %vm2141_vm6 = vcmask 56320   ;;  %vm2430_vm7 = vcmask 130048   ;;  %vm2550_vm8 = vcmask 7168  }
   0x3   :  { %3870 = sst [smem:[#allocation6_spill]] %s3838_s4  ;;  %s3879_s5 = sld [smem:[#allocation5_spill]] }
   0x4   :  { %3871 = sst [smem:[#allocation7_spill]] %s3839_s11 }
   0x5   :  { %3872 = sst [smem:[#allocation8_spill]] %s3840_s7  ;;  %s3880_s7 = sld [smem:[#allocation6_spill]] }
   0x6   :  { %3873 = sst [smem:[#allocation9_spill]] %s3841_s12  ;;  %s3881_s11 = sld [smem:[#allocation7_spill]] }
   0x7   :  { %3874 = sst [smem:[#allocation10_spill]] %s3842_s8  ;;  %s3878_s8 = sld [smem:[#allocation4_spill]] }
   0x8   :  { %3875 = sst [smem:[#allocation11_spill]] %s3843_s9  ;;  %s3253_s12 = smov 32  }
   0x9   :  { %3876 = sst [smem:[#allocation12_spill]] %s3844_s10  ;;  %v130_v3 = vld [vmem:[%s3879_s5] sm:$0xff]  ;;  %s3882_s5 = sld [smem:[#allocation8_spill]] }
   0xa   :  { %3877 = sst [smem:[#allocation13_spill]] %s3845_s14  ;;  %2742 = vmatprep.subr.mxu0 %v130_v3  ;;  %s3252_s10 = smov 64  }
   0xb   :  { %v122_v6 = vld [vmem:[%s3880_s7] sm:$0xff]  ;;  %v123_v7 = vld [vmem:[%s3880_s7 + $0x8] sm:$0xff]  ;;  %2743 = vmatpush3.msra.mxu0 %v130_v3  ;;  %s3883_s14 = sld [smem:[#allocation9_spill]]  ;;  %v124_v49 = vld [vmem:[%s3880_s7 + $0x10] sm:$0xff]  ;;  %s3884_s30 = sld [smem:[#allocation10_spill]] }
   0xc   :  { %2744 = vmatprep.mubr.msk.f32.mxu0 %vm138_vm0, %v122_v6  ;;  %3003 = vmatprep.subr.bf16.mxu0 %v3249_v0  ;;  %v272_v11 = vld [vmem:[%s3881_s11] sm:$0xff]  ;;  %v125_v50 = vld [vmem:[%s3880_s7 + $0x18] sm:$0xff]  ;;  %v127_v52 = vld [vmem:[%s3880_s7 + $0x28] sm:$0xff]  ;;  %s3887_s9 = sld [smem:[#allocation13_spill]] }
   0xd   :  { %v268_v1 = vld [vmem:[%s3878_s8] sm:$0xff]  ;;  %v269_v2 = vld [vmem:[%s3878_s8 + $0x8] sm:$0xff]  ;;  %v270_v8 = vld [vmem:[%s3878_s8 + $0x10] sm:$0xff]  ;;  %2745 = vmatmul.mubr.msk.f32.vlgmr.msra.gmra.mrb[0].mxu0 %vm138_vm0, %v123_v7 }
   0xe   :  { %v3396_v5 = vpack.c.bf16 %v269_v2, %v268_v1  ;;  %v271_v9 = vld [vmem:[%s3878_s8 + $0x18] sm:$0xff]  ;;  %v126_v51 = vld [vmem:[%s3880_s7 + $0x20] sm:$0xff]  ;;  %2747 = vmatprep.mubr.msk.f32.mxu0 %vm138_vm0, %v124_v49  ;;  %v128_v53 = vld [vmem:[%s3880_s7 + $0x30] sm:$0xff] }
   0xf   :  { %v3413_v10 = vpack.c.bf16 %v271_v9, %v270_v8  ;;  %v3436_v13 = vld [vmem:[%s3882_s5] ss:$0 sm:$0xff]  ;;  %v129_v54 = vld [vmem:[%s3880_s7 + $0x38] sm:$0xff]  ;;  %s3885_s7 = sld [smem:[#allocation11_spill]] }
  0x10   :  { %2993 = vmatpush3.bf16.msra.mxu1 %v3396_v5  ;;  %3005 = vmatpush3.bf16.msra.mxu0 %v3396_v5 }
  0x11   :  { %2994 = vmatprep.subr.bf16.mxu1 %v3249_v0  ;;  %3006 = vmatprep.subr.bf16.mxu0 %v3249_v0  ;;  %v273_v20 = vld [vmem:[%s3883_s14] sm:$0xff] }
  0x12   :  { %2748 = vmatmul.mubr.msk.f32.gmra.mrb[2].mxu0 %vm138_vm0, %v125_v50 }
  0x13   :  { %2750 = vmatprep.mubr.msk.f32.mxu0 %vm138_vm0, %v126_v51 }
  0x14   :  { %2996 = vmatpush3.bf16.msra.mxu1 %v3413_v10  ;;  %3008 = vmatpush3.bf16.msra.mxu0 %v3413_v10 }
  0x15   :  { %2997 = vmatprep.subr.bf16.mxu1 %v3249_v0  ;;  %3015 = vmatprep.subr.bf16.mxu0 %v3249_v0 }
  0x16   :  { %2751 = vmatmul.mubr.msk.f32.gmra.mrb[4].mxu0 %vm138_vm0, %v127_v52 }
  0x17   :  { %2765 = vmatmul.mubr.msk.f32.vlgmr.msra.gmra.mrb[0].mxu1 %vm274_vm2, %v272_v11  ;;  %2753 = vmatprep.mubr.msk.f32.mxu0 %vm138_vm0, %v128_v53 }
  0x18   :  { %2999 = vmatpush3.bf16.msra.mxu1 %v3396_v5  ;;  %2775 = vmatprep.mubr.msk.f32.mxu1 %vm3250_vm1, %v3251_v4 }
  0x19   :  { %3000 = vmatprep.subr.bf16.mxu1 %v3249_v0 }
  0x1a   :  { %2754 = vmatmul.mubr.msk.f32.gmra.mrb[6].mxu0 %vm138_vm0, %v129_v54 }
  0x1b   :  { %2786 = vmatprep.mubr.msk.f32.mxu0 %vm3250_vm1, %v3251_v4 }
  0x1c   :  { %3002 = vmatpush3.bf16.msra.mxu1 %v3413_v10 }
  0x1d   :  { %3009 = vmatprep.subr.bf16.mxu1 %v3249_v0 }
  0xe0   :  { %v2746_v12 = vpop.f32.mrb[0].mxu0 }
  0xe1   :  { %v229_v14 = vpop.f32.mrb[1].mxu0  ;;  %v235_v35 = vadd.f32 %v2746_v12, %v3436_v13 }
  0xe2   :  { %v230_v15 = vadd.f32 %v3436_v13, %v229_v14 }
  0xe5   :  { %v2749_v58 = vpop.f32.mrb[2].mxu0 }
  0xe6   :  { %v239_v59 = vpop.f32.mrb[3].mxu0 }
  0xe7   :  { %v240_v2 = vadd.f32 %v3436_v13, %v239_v59 }
  0xe9   :  { %v3486_v60 = vpop.f32.mrb[4].mxu0 }
  0xea   :  { %v344_v16 = vpop.f32.mrb[0].mxu1  ;;  %v3488_v61 = vpop.f32.mrb[5].mxu0 }
  0xeb   :  { %v348_v17 = vadd.f32 %v344_v16, %v230_v15  ;;  %v2766_v18 = vpop.f32.mrb[1].mxu1 }
  0xed   :  { %3115 = vtanh.f32 %v348_v17  ;;  %v2568_v21 = vmul.f32 -1.442695, %v348_v17  ;;  %v3490_v62 = vpop.f32.mrb[6].mxu0 }
  0xee   :  { %v3492_v63 = vpop.f32.mrb[7].mxu0 }
  0xef   :  { %3117 = vpow2.f32 %v2568_v21 }
  0xf7   :  { %v3116_v19 = vpop.eup %3115 }
  0xf8   :  { %362 = vrot.lane.b32.xlu0 %v3116_v19, %s3252_s10 }
  0xf9   :  { %v3118_v22 = vpop.eup %3117 }
  0xfa   :  { %v352_v23 = vadd.f32 1.0, %v3118_v22 }
  0xfc   :  { %357 = vrot.lane.b32.xlu0 %v273_v20, %s3253_s12  ;;  %3119 = vrcp.f32 %v352_v23 }
 0x106   :  { %v3120_v24 = vpop.eup %3119 }
 0x16a   :  { %v363_v25 = vpop.permute.xlu0 %362 }
 0x16b   :  { %v365_v26 = vmul.f32 %v3120_v24, %v363_v25 }
 0x16d   :  { %367 = vrot.lane.b32.xlu1 %v365_v26, %s3253_s12 }
 0x16e   :  { %v358_v27 = vpop.permute.xlu0 %357 }
 0x16f   :  { %v360_v28 = vmul.f32 %v3120_v24, %v358_v27 }
 0x1df   :  { %v368_v29 = vpop.permute.xlu1 %367 }
 0x1e0   :  { %v370_v30 = vadd.f32 %v368_v29, %v360_v28 }
 0x1e2   :  { %3121 = vtanh.f32 %v370_v30 }
 0x1ec   :  { %v3122_v31 = vpop.eup %3121 }
 0x1ed   :  { %373 = vrot.lane.b32.xlu1 %v3122_v31, %s3252_s10 }
 0x25f   :  { %v374_v32 = vpop.permute.xlu1 %373 }
 0x260   :  { %v376_v33 = vmul.f32 %v3120_v24, %v374_v32  ;;  %v245_v24 = vadd.f32 %v2749_v58, %v3436_v13 }
 0x262   :  { %378 = vrot.lane.b32.xlu0 %v376_v33, %s3253_s12 }
 0x2d4   :  { %v379_v34 = vpop.permute.xlu0 %378 }
 0x2d5   :  { %381 = vst.msk [vmem:[#allocation2] sm:$0xff] %vm274_vm2, %v379_v34  ;;  %2776 = vmatmul.mubr.msk.f32.vlgmr.msra.gmra.mrb[2].mxu1 %vm274_vm2, %v379_v34 }
 0x2d6   :  { %3011 = vmatpush3.bf16.msra.mxu1 %v3396_v5  ;;  %2797 = vmatprep.mubr.msk.f32.mxu1 %vm3250_vm1, %v3251_v4 }
 0x2d7   :  { %3012 = vmatprep.subr.bf16.mxu1 %v3249_v0 }
 0x2da   :  { %3014 = vmatpush3.bf16.msra.mxu1 %v3413_v10 }
 0x2db   :  { %3021 = vmatprep.subr.bf16.mxu1 %v3249_v0 }
 0x3a8   :  { %v450_v36 = vpop.f32.mrb[2].mxu1 }
 0x3a9   :  { %v454_v37 = vadd.f32 %v450_v36, %v235_v35  ;;  %v2777_v38 = vpop.f32.mrb[3].mxu1 }
 0x3ab   :  { %3123 = vtanh.f32 %v454_v37  ;;  %v2570_v40 = vmul.f32 -1.442695, %v454_v37 }
 0x3ad   :  { %3125 = vpow2.f32 %v2570_v40 }
 0x3b5   :  { %v3124_v39 = vpop.eup %3123 }
 0x3b6   :  { %464 = vrot.lane.b32.xlu1 %v3124_v39, %s3252_s10 }
 0x3b7   :  { %v3126_v41 = vpop.eup %3125 }
 0x3b8   :  { %v458_v42 = vadd.f32 1.0, %v3126_v41 }
 0x3ba   :  { %3127 = vrcp.f32 %v458_v42  ;;  %v250_v42 = vadd.f32 %v3436_v13, %v3488_v61  ;;  %v255_v61 = vadd.f32 %v3486_v60, %v3436_v13 }
 0x3c4   :  { %v3128_v43 = vpop.eup %3127 }
 0x3c5   :  { %v462_v46 = vmul.f32 %v3128_v43, %v370_v30 }
 0x428   :  { %v465_v44 = vpop.permute.xlu1 %464 }
 0x429   :  { %v467_v45 = vmul.f32 %v3128_v43, %v465_v44 }
 0x42b   :  { %469 = vrot.lane.b32.xlu0 %v467_v45, %s3253_s12 }
 0x49d   :  { %v470_v47 = vpop.permute.xlu0 %469 }
 0x49e   :  { %v472_v48 = vadd.f32 %v470_v47, %v462_v46 }
 0x4a0   :  { %3129 = vtanh.f32 %v472_v48 }
 0x4aa   :  { %v3130_v55 = vpop.eup %3129 }
 0x4ab   :  { %475 = vrot.lane.b32.xlu1 %v3130_v55, %s3252_s10 }
 0x51d   :  { %v476_v56 = vpop.permute.xlu1 %475 }
 0x51e   :  { %v478_v57 = vmul.f32 %v3128_v43, %v476_v56 }
 0x520   :  { %480 = vrot.lane.b32.xlu0 %v478_v57, %s3253_s12 }
 0x592   :  { %v481_v1 = vpop.permute.xlu0 %480 }
 0x593   :  { %484 = vst.msk [vmem:[#allocation2 + $0x8] sm:$0xff] %vm274_vm2, %v481_v1  ;;  %2787 = vmatmul.mubr.msk.f32.vlgmr.msra.gmra.mrb[8].mxu0 %vm274_vm2, %v481_v1 }
 0x594   :  { %3017 = vmatpush3.bf16.msra.mxu0 %v3396_v5  ;;  %2808 = vmatprep.mubr.msk.f32.mxu0 %vm3250_vm1, %v3251_v4 }
 0x595   :  { %3018 = vmatprep.subr.bf16.mxu0 %v3249_v0 }
 0x598   :  { %3020 = vmatpush3.bf16.msra.mxu0 %v3413_v10 }
 0x599   :  { %3027 = vmatprep.subr.bf16.mxu0 %v3249_v0 }
 0x666   :  { %v553_v3 = vpop.f32.mrb[8].mxu0 }
 0x667   :  { %v557_v6 = vadd.f32 %v553_v3, %v240_v2  ;;  %v2788_v7 = vpop.f32.mrb[9].mxu0 }
 0x669   :  { %3131 = vtanh.f32 %v557_v6  ;;  %v2572_v9 = vmul.f32 -1.442695, %v557_v6 }
 0x66b   :  { %3133 = vpow2.f32 %v2572_v9 }
 0x673   :  { %v3132_v8 = vpop.eup %3131 }
 0x674   :  { %567 = vrot.lane.b32.xlu1 %v3132_v8, %s3252_s10 }
 0x675   :  { %v3134_v11 = vpop.eup %3133 }
 0x676   :  { %v561_v12 = vadd.f32 1.0, %v3134_v11 }
 0x678   :  { %3135 = vrcp.f32 %v561_v12 }
 0x682   :  { %v3136_v14 = vpop.eup %3135 }
 0x683   :  { %v565_v17 = vmul.f32 %v3136_v14, %v472_v48 }
 0x6e6   :  { %v568_v15 = vpop.permute.xlu1 %567 }
 0x6e7   :  { %v570_v16 = vmul.f32 %v3136_v14, %v568_v15  ;;  %v1111_v15 = vld [vmem:[%s3884_s30] sm:$0xff] }
 0x6e9   :  { %572 = vrot.lane.b32.xlu0 %v570_v16, %s3253_s12  ;;  %v1112_v16 = vld [vmem:[%s3884_s30 + $0x8] sm:$0xff] }
 0x75b   :  { %v573_v18 = vpop.permute.xlu0 %572 }
 0x75c   :  { %v575_v19 = vadd.f32 %v573_v18, %v565_v17  ;;  %v3039_v17 = vpack.c.bf16 %v1112_v16, %v1111_v15 }
 0x75e   :  { %3137 = vtanh.f32 %v575_v19 }
 0x768   :  { %v3138_v20 = vpop.eup %3137 }
 0x769   :  { %578 = vrot.lane.b32.xlu1 %v3138_v20, %s3252_s10 }
 0x7db   :  { %v579_v21 = vpop.permute.xlu1 %578 }
 0x7dc   :  { %v581_v22 = vmul.f32 %v3136_v14, %v579_v21  ;;  %v1113_v21 = vld [vmem:[%s3884_s30 + $0x10] sm:$0xff] }
 0x7de   :  { %583 = vrot.lane.b32.xlu0 %v581_v22, %s3253_s12  ;;  %v1114_v22 = vld [vmem:[%s3884_s30 + $0x18] sm:$0xff] }
 0x850   :  { %v584_v23 = vpop.permute.xlu0 %583 }
 0x851   :  { %587 = vst.msk [vmem:[#allocation2 + $0x10] sm:$0xff] %vm274_vm2, %v584_v23  ;;  %2798 = vmatmul.mubr.msk.f32.vlgmr.msra.gmra.mrb[4].mxu1 %vm274_vm2, %v584_v23  ;;  %v3043_v23 = vpack.c.bf16 %v1114_v22, %v1113_v21 }
 0x852   :  { %3023 = vmatpush3.bf16.msra.mxu1 %v3396_v5  ;;  %2819 = vmatprep.mubr.msk.f32.mxu1 %vm3250_vm1, %v3251_v4 }
 0x853   :  { %3024 = vmatprep.subr.bf16.mxu1 %v3249_v0 }
 0x856   :  { %3026 = vmatpush3.bf16.msra.mxu1 %v3413_v10 }
 0x857   :  { %3033 = vmatprep.subr.bf16.mxu1 %v3249_v0 }
 0x924   :  { %v656_v25 = vpop.f32.mrb[4].mxu1 }
 0x925   :  { %v660_v26 = vadd.f32 %v656_v25, %v245_v24  ;;  %v2799_v27 = vpop.f32.mrb[5].mxu1  ;;  %v1103_v25 = vld [vmem:[#allocation2] sm:$0xff] }
 0x926   :  { %v1105_v27 = vld [vmem:[#allocation2 + $0x10] sm:$0xff] }
 0x927   :  { %3139 = vtanh.f32 %v660_v26  ;;  %v2574_v29 = vmul.f32 -1.442695, %v660_v26  ;;  %v1104_v26 = vld [vmem:[#allocation2 + $0x8] sm:$0xff] }
 0x929   :  { %3141 = vpow2.f32 %v2574_v29 }
 0x931   :  { %v3140_v28 = vpop.eup %3139 }
 0x932   :  { %670 = vrot.lane.b32.xlu1 %v3140_v28, %s3252_s10 }
 0x933   :  { %v3142_v30 = vpop.eup %3141 }
 0x934   :  { %v664_v31 = vadd.f32 1.0, %v3142_v30 }
 0x936   :  { %3143 = vrcp.f32 %v664_v31  ;;  %v260_v31 = vadd.f32 %v3436_v13, %v3492_v63 }
 0x940   :  { %v3144_v32 = vpop.eup %3143 }
 0x941   :  { %v668_v35 = vmul.f32 %v3144_v32, %v575_v19 }
 0x9a4   :  { %v671_v33 = vpop.permute.xlu1 %670 }
 0x9a5   :  { %v673_v34 = vmul.f32 %v3144_v32, %v671_v33 }
 0x9a7   :  { %675 = vrot.lane.b32.xlu0 %v673_v34, %s3253_s12 }
 0xa19   :  { %v676_v36 = vpop.permute.xlu0 %675 }
 0xa1a   :  { %v678_v37 = vadd.f32 %v676_v36, %v668_v35 }
 0xa1c   :  { %3145 = vtanh.f32 %v678_v37 }
 0xa26   :  { %v3146_v38 = vpop.eup %3145 }
 0xa27   :  { %681 = vrot.lane.b32.xlu1 %v3146_v38, %s3252_s10 }
 0xa99   :  { %v682_v39 = vpop.permute.xlu1 %681 }
 0xa9a   :  { %v684_v40 = vmul.f32 %v3144_v32, %v682_v39 }
 0xa9c   :  { %686 = vrot.lane.b32.xlu0 %v684_v40, %s3253_s12 }
 0xb0e   :  { %v687_v41 = vpop.permute.xlu0 %686 }
 0xb0f   :  { %690 = vst.msk [vmem:[#allocation2 + $0x18] sm:$0xff] %vm274_vm2, %v687_v41  ;;  %2809 = vmatmul.mubr.msk.f32.vlgmr.msra.gmra.mrb[10].mxu0 %vm274_vm2, %v687_v41 }
 0xb10   :  { %3029 = vmatpush3.bf16.msra.mxu0 %v3396_v5  ;;  %2830 = vmatprep.mubr.msk.f32.mxu0 %vm3250_vm1, %v3251_v4 }
 0xb11   :  { %3030 = vmatprep.subr.bf16.mxu0 %v3249_v0 }
 0xb14   :  { %3032 = vmatpush3.bf16.msra.mxu0 %v3413_v10 }
 0xb15   :  { %3040 = vmatprep.subr.bf16.mxu0 %v3039_v17 }
 0xb16   :  { %v1106_v28 = vld [vmem:[#allocation2 + $0x18] sm:$0xff] }
 0xbe2   :  { %v759_v43 = vpop.f32.mrb[10].mxu0 }
 0xbe3   :  { %v763_v44 = vadd.f32 %v759_v43, %v250_v42  ;;  %v2810_v45 = vpop.f32.mrb[11].mxu0 }
 0xbe5   :  { %3147 = vtanh.f32 %v763_v44  ;;  %v2576_v47 = vmul.f32 -1.442695, %v763_v44 }
 0xbe7   :  { %3149 = vpow2.f32 %v2576_v47 }
 0xbef   :  { %v3148_v46 = vpop.eup %3147 }
 0xbf0   :  { %773 = vrot.lane.b32.xlu1 %v3148_v46, %s3252_s10 }
 0xbf1   :  { %v3150_v48 = vpop.eup %3149 }
 0xbf2   :  { %v767_v49 = vadd.f32 1.0, %v3150_v48 }
 0xbf4   :  { %3151 = vrcp.f32 %v767_v49 }
 0xbfe   :  { %v3152_v50 = vpop.eup %3151 }
 0xbff   :  { %v771_v53 = vmul.f32 %v3152_v50, %v678_v37 }
 0xc62   :  { %v774_v51 = vpop.permute.xlu1 %773 }
 0xc63   :  { %v776_v52 = vmul.f32 %v3152_v50, %v774_v51  ;;  %v1251_v51 = vld [vmem:[%s3885_s7] sm:$0xff] }
 0xc65   :  { %778 = vrot.lane.b32.xlu0 %v776_v52, %s3253_s12  ;;  %v1252_v52 = vld [vmem:[%s3885_s7 + $0x8] sm:$0xff] }
 0xcd7   :  { %v779_v54 = vpop.permute.xlu0 %778 }
 0xcd8   :  { %v781_v55 = vadd.f32 %v779_v54, %v771_v53  ;;  %v3592_v53 = vpack.c.bf16 %v1252_v52, %v1251_v51  ;;  %v1253_v54 = vld [vmem:[%s3885_s7 + $0x10] sm:$0xff] }
 0xcda   :  { %3153 = vtanh.f32 %v781_v55 }
 0xce4   :  { %v3154_v56 = vpop.eup %3153 }
 0xce5   :  { %784 = vrot.lane.b32.xlu1 %v3154_v56, %s3252_s10 }
 0xd57   :  { %v785_v57 = vpop.permute.xlu1 %784 }
 0xd58   :  { %v787_v58 = vmul.f32 %v3152_v50, %v785_v57 }
 0xd5a   :  { %789 = vrot.lane.b32.xlu0 %v787_v58, %s3253_s12 }
 0xdcc   :  { %v790_v59 = vpop.permute.xlu0 %789 }
 0xdcd   :  { %793 = vst.msk [vmem:[#allocation2 + $0x20] sm:$0xff] %vm274_vm2, %v790_v59  ;;  %2820 = vmatmul.mubr.msk.f32.vlgmr.msra.gmra.mrb[6].mxu1 %vm274_vm2, %v790_v59  ;;  %v2593_v59 = vld [vmem:[%s3883_s14 + $0x8] sm:$0xff] }
 0xdce   :  { %3035 = vmatpush3.bf16.msra.mxu1 %v3396_v5  ;;  %2841 = vmatprep.mubr.msk.f32.mxu1 %vm3250_vm1, %v3251_v4 }
 0xdcf   :  { %3036 = vmatprep.subr.bf16.mxu1 %v3249_v0 }
 0xdd2   :  { %3038 = vmatpush3.bf16.msra.mxu1 %v3413_v10 }
 0xdd3   :  { %3047 = vmatprep.subr.bf16.mxu1 %v3249_v0 }
 0xdd4   :  { %v1107_v29 = vld [vmem:[#allocation2 + $0x20] sm:$0xff] }
 0xea0   :  { %v862_v1 = vpop.f32.mrb[6].mxu1 }
 0xea1   :  { %v866_v2 = vadd.f32 %v862_v1, %v255_v61  ;;  %v2821_v3 = vpop.f32.mrb[7].mxu1  ;;  %v2592_v1 = vld [vmem:[%s3881_s11 + $0x8] sm:$0xff] }
 0xea2   :  { %v265_v3 = vadd.f32 %v3490_v62, %v3436_v13 }
 0xea3   :  { %3155 = vtanh.f32 %v866_v2  ;;  %v2578_v5 = vmul.f32 -1.442695, %v866_v2 }
 0xea5   :  { %3157 = vpow2.f32 %v2578_v5 }
 0xead   :  { %v3156_v6 = vpop.eup %3155 }
 0xeae   :  { %876 = vrot.lane.b32.xlu1 %v3156_v6, %s3252_s10 }
 0xeaf   :  { %v3158_v7 = vpop.eup %3157 }
 0xeb0   :  { %v870_v8 = vadd.f32 1.0, %v3158_v7 }
 0xeb2   :  { %3159 = vrcp.f32 %v870_v8 }
 0xebc   :  { %v3160_v9 = vpop.eup %3159 }
 0xebd   :  { %v874_v12 = vmul.f32 %v3160_v9, %v781_v55  ;;  %v1254_v55 = vld [vmem:[%s3885_s7 + $0x18] sm:$0xff]  ;;  %s3886_s7 = sld [smem:[#allocation12_spill]] }
 0xebe   :  { %v3602_v56 = vpack.c.bf16 %v1254_v55, %v1253_v54 }
 0xec3   :  { %v3635_v8 = vld [vmem:[%s3886_s7] ss:$0 sm:$0xff] }
 0xf20   :  { %v877_v11 = vpop.permute.xlu1 %876 }
 0xf21   :  { %v879_v10 = vmul.f32 %v3160_v9, %v877_v11 }
 0xf23   :  { %881 = vrot.lane.b32.xlu0 %v879_v10, %s3253_s12 }
 0xf95   :  { %v882_v14 = vpop.permute.xlu0 %881 }
 0xf96   :  { %v884_v60 = vadd.f32 %v882_v14, %v874_v12 }
 0xf98   :  { %3161 = vtanh.f32 %v884_v60 }
 0xfa2   :  { %v3162_v18 = vpop.eup %3161 }
 0xfa3   :  { %887 = vrot.lane.b32.xlu1 %v3162_v18, %s3252_s10 }
0x1015   :  { %v888_v19 = vpop.permute.xlu1 %887 }
0x1016   :  { %v890_v20 = vmul.f32 %v3160_v9, %v888_v19 }
0x1018   :  { %892 = vrot.lane.b32.xlu0 %v890_v20, %s3253_s12 }
0x108a   :  { %v893_v24 = vpop.permute.xlu0 %892 }
0x108b   :  { %896 = vst.msk [vmem:[#allocation2 + $0x28] sm:$0xff] %vm274_vm2, %v893_v24  ;;  %2831 = vmatmul.mubr.msk.f32.vlgmr.msra.gmra.mrb[12].mxu0 %vm274_vm2, %v893_v24 }
0x108c   :  { %3042 = vmatpush3.bf16.msra.mxu0 %v3039_v17  ;;  %2852 = vmatprep.mubr.msk.f32.mxu0 %vm274_vm2, %v1103_v25 }
0x108d   :  { %3044 = vmatprep.subr.bf16.mxu0 %v3043_v23 }
0x1090   :  { %3046 = vmatpush3.bf16.msra.mxu0 %v3043_v23 }
0x1091   :  { %3059 = vmatprep.subr.bf16.mxu0 %v3249_v0 }
0x1092   :  { %v1108_v30 = vld [vmem:[#allocation2 + $0x28] sm:$0xff] }
0x1093   :  { %2853 = vmatmul.mubr.msk.f32.vlgmr.msra.gmra.mrb[14].mxu0 %vm274_vm2, %v1104_v26 }
0x1094   :  { %2855 = vmatprep.mubr.msk.f32.mxu0 %vm274_vm2, %v1105_v27  ;;  %3061 = vmatpush3.bf16.msra.mxu0 %v3592_v53 }
0x1095   :  { %3062 = vmatprep.subr.bf16.mxu0 %v3249_v0 }
0x1097   :  { %2856 = vmatmul.mubr.msk.f32.gmra.mrb[16].mxu0 %vm274_vm2, %v1106_v28 }
0x1098   :  { %2858 = vmatprep.mubr.msk.f32.mxu0 %vm274_vm2, %v1107_v29  ;;  %3064 = vmatpush3.bf16.msra.mxu0 %v3602_v56 }
0x1099   :  { %3071 = vmatprep.subr.bf16.mxu0 %v3249_v0 }
0x109b   :  { %2859 = vmatmul.mubr.msk.f32.gmra.mrb[18].mxu0 %vm274_vm2, %v1108_v30 }
0x115e   :  { %v965_v32 = vpop.f32.mrb[12].mxu0 }
0x115f   :  { %v969_v33 = vadd.f32 %v965_v32, %v260_v31  ;;  %v2832_v34 = vpop.f32.mrb[13].mxu0 }
0x1161   :  { %3163 = vtanh.f32 %v969_v33  ;;  %v2580_v42 = vmul.f32 -1.442695, %v969_v33 }
0x1163   :  { %3165 = vpow2.f32 %v2580_v42 }
0x1166   :  { %v3570_v35 = vpop.f32.mrb[14].mxu0 }
0x1167   :  { %v1212_v36 = vpop.f32.mrb[15].mxu0 }
0x1168   :  { %v1213_v9 = vadd.f32 %v3635_v8, %v1212_v36 }
0x116a   :  { %v3572_v37 = vpop.f32.mrb[16].mxu0 }
0x116b   :  { %v3164_v38 = vpop.eup %3163  ;;  %v3574_v39 = vpop.f32.mrb[17].mxu0 }
0x116c   :  { %979 = vrot.lane.b32.xlu1 %v3164_v38, %s3252_s10 }
0x116d   :  { %v3166_v63 = vpop.eup %3165 }
0x116e   :  { %v3577_v40 = vpop.f32.mrb[18].mxu0  ;;  %v973_v43 = vadd.f32 1.0, %v3166_v63 }
0x116f   :  { %v3579_v41 = vpop.f32.mrb[19].mxu0 }
0x1170   :  { %3167 = vrcp.f32 %v973_v43  ;;  %v1218_v43 = vadd.f32 %v3570_v35, %v3635_v8 }
0x117a   :  { %v3168_v44 = vpop.eup %3167 }
0x117b   :  { %v977_v47 = vmul.f32 %v3168_v44, %v884_v60 }
0x11de   :  { %v980_v45 = vpop.permute.xlu1 %979 }
0x11df   :  { %v982_v46 = vmul.f32 %v3168_v44, %v980_v45 }
0x11e1   :  { %984 = vrot.lane.b32.xlu0 %v982_v46, %s3253_s12 }
0x1253   :  { %v985_v48 = vpop.permute.xlu0 %984 }
0x1254   :  { %v3582_v49 = vadd.f32 %v985_v48, %v977_v47 }
0x1256   :  { %3169 = vtanh.f32 %v3582_v49 }
0x1260   :  { %v3170_v50 = vpop.eup %3169 }
0x1261   :  { %990 = vrot.lane.b32.xlu1 %v3170_v50, %s3252_s10 }
0x12d3   :  { %v991_v57 = vpop.permute.xlu1 %990 }
0x12d4   :  { %v993_v58 = vmul.f32 %v3168_v44, %v991_v57 }
0x12d6   :  { %995 = vrot.lane.b32.xlu0 %v993_v58, %s3253_s12 }
0x12da   :  { %1341 = vrot.lane.b32.xlu0 %v2593_v59, %s3253_s12 }
0x1348   :  { %v996_v61 = vpop.permute.xlu0 %995 }
0x1349   :  { %999 = vst.msk [vmem:[#allocation2 + $0x30] sm:$0xff] %vm274_vm2, %v996_v61  ;;  %2842 = vmatmul.mubr.msk.f32.vlgmr.msra.gmra.mrb[8].mxu1 %vm274_vm2, %v996_v61 }
0x134a   :  { %3049 = vmatpush3.bf16.msra.mxu1 %v3592_v53  ;;  %2872 = vmatprep.mubr.msk.f32.mxu1 %vm3250_vm1, %v3251_v4 }
0x134b   :  { %3050 = vmatprep.subr.bf16.mxu1 %v3249_v0 }
0x134c   :  { %v1342_v18 = vpop.permute.xlu0 %1341 }
0x134e   :  { %3052 = vmatpush3.bf16.msra.mxu1 %v3602_v56 }
0x134f   :  { %3053 = vmatprep.subr.bf16.mxu1 %v3249_v0 }
0x1350   :  { %v1109_v2 = vld [vmem:[#allocation2 + $0x30] sm:$0xff] }
0x1351   :  { %2873 = vmatmul.mubr.msk.f32.vlgmr.msra.gmra.mrb[10].mxu1 %vm274_vm2, %v2592_v1  ;;  %2861 = vmatprep.mubr.msk.f32.mxu0 %vm274_vm2, %v1109_v2 }
0x1352   :  { %3055 = vmatpush3.bf16.msra.mxu1 %v3592_v53  ;;  %2883 = vmatprep.mubr.msk.f32.mxu1 %vm3250_vm1, %v3251_v4 }
0x1353   :  { %3056 = vmatprep.subr.bf16.mxu1 %v3249_v0 }
0x1356   :  { %3058 = vmatpush3.bf16.msra.mxu1 %v3602_v56 }
0x1357   :  { %3065 = vmatprep.subr.bf16.mxu1 %v3249_v0 }
0x141c   :  { %v1068_v6 = vpop.f32.mrb[8].mxu1 }
0x141d   :  { %v1072_v5 = vadd.f32 %v1068_v6, %v265_v3  ;;  %v2843_v7 = vpop.f32.mrb[9].mxu1 }
0x141e   :  { %v1223_v7 = vadd.f32 %v3635_v8, %v3574_v39 }
0x141f   :  { %v2582_v24 = vmul.f32 -1.442695, %v1072_v5 }
0x1424   :  { %v1328_v11 = vpop.f32.mrb[10].mxu1 }
0x1425   :  { %v1332_v10 = vadd.f32 %v1328_v11, %v1213_v9  ;;  %v2874_v12 = vpop.f32.mrb[11].mxu1 }
0x1427   :  { %3171 = vtanh.f32 %v1332_v10  ;;  %v2595_v60 = vmul.f32 -1.442695, %v1332_v10 }
0x1429   :  { %3173 = vpow2.f32 %v2595_v60 }
0x1431   :  { %v3172_v14 = vpop.eup %3171 }
0x1432   :  { %1346 = vrot.lane.b32.xlu1 %v3172_v14, %s3252_s10 }
0x1433   :  { %v3174_v13 = vpop.eup %3173 }
0x1434   :  { %v1336_v62 = vadd.f32 1.0, %v3174_v13 }
0x1436   :  { %3175 = vrcp.f32 %v1336_v62 }
0x1440   :  { %v3176_v15 = vpop.eup %3175 }
0x1441   :  { %v1344_v19 = vmul.f32 %v3176_v15, %v1342_v18 }
0x14a4   :  { %v1347_v16 = vpop.permute.xlu1 %1346 }
0x14a5   :  { %v1349_v17 = vmul.f32 %v3176_v15, %v1347_v16 }
0x14a7   :  { %1351 = vrot.lane.b32.xlu1 %v1349_v17, %s3253_s12 }
0x1519   :  { %v1352_v20 = vpop.permute.xlu1 %1351 }
0x151a   :  { %v1354_v21 = vadd.f32 %v1352_v20, %v1344_v19 }
0x151c   :  { %3177 = vtanh.f32 %v1354_v21 }
0x151d   :  { %3179 = vtanh.f32 %v1072_v5 }
0x151e   :  { %3181 = vpow2.f32 %v2582_v24 }
0x1526   :  { %v3178_v22 = vpop.eup %3177 }
0x1527   :  { %1357 = vrot.lane.b32.xlu0 %v3178_v22, %s3252_s10  ;;  %v3180_v23 = vpop.eup %3179 }
0x1528   :  { %v3182_v25 = vpop.eup %3181 }
0x1529   :  { %v1076_v26 = vadd.f32 1.0, %v3182_v25 }
0x152b   :  { %1082 = vrot.lane.b32.xlu0 %v3180_v23, %s3252_s10  ;;  %3183 = vrcp.f32 %v1076_v26  ;;  %v1228_v23 = vadd.f32 %v3572_v37, %v3635_v8 }
0x1535   :  { %v3184_v29 = vpop.eup %3183 }
0x1536   :  { %v1080_v33 = vmul.f32 %v3184_v29, %v3582_v49 }
0x1599   :  { %v1358_v27 = vpop.permute.xlu0 %1357 }
0x159a   :  { %v1360_v28 = vmul.f32 %v3176_v15, %v1358_v27 }
0x159c   :  { %1362 = vrot.lane.b32.xlu1 %v1360_v28, %s3253_s12 }
0x159d   :  { %v1083_v30 = vpop.permute.xlu0 %1082 }
0x159e   :  { %v1085_v31 = vmul.f32 %v3184_v29, %v1083_v30 }
0x15a0   :  { %1087 = vrot.lane.b32.xlu0 %v1085_v31, %s3253_s12 }
0x160e   :  { %v1363_v32 = vpop.permute.xlu1 %1362 }
0x160f   :  { %2884 = vmatmul.mubr.msk.f32.vlgmr.msra.gmra.mrb[12].mxu1 %vm274_vm2, %v1363_v32 }
0x1610   :  { %3067 = vmatpush3.bf16.msra.mxu1 %v3592_v53  ;;  %2905 = vmatprep.mubr.msk.f32.mxu1 %vm3250_vm1, %v3251_v4 }
0x1611   :  { %3068 = vmatprep.subr.bf16.mxu1 %v3249_v0 }
0x1612   :  { %v1088_v34 = vpop.permute.xlu0 %1087 }
0x1613   :  { %v1090_v36 = vadd.f32 %v1088_v34, %v1080_v33 }
0x1614   :  { %3070 = vmatpush3.bf16.msra.mxu1 %v3602_v56 }
0x1615   :  { %3185 = vtanh.f32 %v1090_v36  ;;  %3077 = vmatprep.subr.bf16.mxu1 %v3249_v0 }
0x161f   :  { %v3186_v38 = vpop.eup %3185 }
0x1620   :  { %1093 = vrot.lane.b32.xlu0 %v3186_v38, %s3252_s10 }
0x1692   :  { %v1094_v42 = vpop.permute.xlu0 %1093 }
0x1693   :  { %v1096_v63 = vmul.f32 %v3184_v29, %v1094_v42 }
0x1695   :  { %1098 = vrot.lane.b32.xlu0 %v1096_v63, %s3253_s12 }
0x16e2   :  { %v1432_v44 = vpop.f32.mrb[12].mxu1 }
0x16e3   :  { %v1436_v45 = vadd.f32 %v1432_v44, %v1218_v43  ;;  %v2885_v46 = vpop.f32.mrb[13].mxu1  ;;  %v1233_v44 = vadd.f32 %v3635_v8, %v3579_v41 }
0x16e5   :  { %3187 = vtanh.f32 %v1436_v45  ;;  %v2597_v50 = vmul.f32 -1.442695, %v1436_v45 }
0x16e7   :  { %3189 = vpow2.f32 %v2597_v50 }
0x16ef   :  { %v3188_v47 = vpop.eup %3187 }
0x16f0   :  { %1446 = vrot.lane.b32.xlu1 %v3188_v47, %s3252_s10 }
0x16f1   :  { %v3190_v51 = vpop.eup %3189 }
0x16f2   :  { %v1440_v35 = vadd.f32 1.0, %v3190_v51 }
0x16f4   :  { %3191 = vrcp.f32 %v1440_v35 }
0x16fe   :  { %v3192_v52 = vpop.eup %3191 }
0x16ff   :  { %v1444_v57 = vmul.f32 %v3192_v52, %v1354_v21 }
0x1707   :  { %v1099_v48 = vpop.permute.xlu0 %1098 }
0x1708   :  { %1102 = vst.msk [vmem:[#allocation2 + $0x38] sm:$0xff] %vm274_vm2, %v1099_v48 }
0x170f   :  { %v1110_v49 = vld [vmem:[#allocation2 + $0x38] sm:$0xff] }
0x1710   :  { %2862 = vmatmul.mubr.msk.f32.gmra.mrb[20].mxu0 %vm274_vm2, %v1110_v49 }
0x1711   :  { %2894 = vmatprep.mubr.msk.f32.mxu0 %vm3250_vm1, %v3251_v4 }
0x1762   :  { %v1447_v54 = vpop.permute.xlu1 %1446 }
0x1763   :  { %v1449_v55 = vmul.f32 %v3192_v52, %v1447_v54 }
0x1765   :  { %1451 = vrot.lane.b32.xlu1 %v1449_v55, %s3253_s12 }
0x17d7   :  { %v1452_v58 = vpop.permute.xlu1 %1451 }
0x17d8   :  { %v1454_v59 = vadd.f32 %v1452_v58, %v1444_v57 }
0x17da   :  { %3193 = vtanh.f32 %v1454_v59 }
0x17e3   :  { %v3662_v61 = vpop.f32.mrb[20].mxu0 }
0x17e4   :  { %v3194_v1 = vpop.eup %3193  ;;  %v3664_v2 = vpop.f32.mrb[21].mxu0 }
0x17e5   :  { %1457 = vrot.lane.b32.xlu1 %v3194_v1, %s3252_s10 }
0x1857   :  { %v1458_v3 = vpop.permute.xlu1 %1457 }
0x1858   :  { %v1460_v6 = vmul.f32 %v3192_v52, %v1458_v3 }
0x185a   :  { %1462 = vrot.lane.b32.xlu1 %v1460_v6, %s3253_s12  ;;  %v1238_v6 = vadd.f32 %v3577_v40, %v3635_v8 }
0x18cc   :  { %v1463_v5 = vpop.permute.xlu1 %1462 }
0x18cd   :  { %2895 = vmatmul.mubr.msk.f32.vlgmr.msra.gmra.mrb[22].mxu0 %vm274_vm2, %v1463_v5 }
0x18ce   :  { %3073 = vmatpush3.bf16.msra.mxu0 %v3592_v53  ;;  %2916 = vmatprep.mubr.msk.f32.mxu0 %vm3250_vm1, %v3251_v4 }
0x18cf   :  { %3074 = vmatprep.subr.bf16.mxu0 %v3249_v0 }
0x18d2   :  { %3076 = vmatpush3.bf16.msra.mxu0 %v3602_v56 }
0x18d3   :  { %3083 = vmatprep.subr.bf16.mxu0 %v3249_v0 }
0x19a0   :  { %v1532_v9 = vpop.f32.mrb[22].mxu0 }
0x19a1   :  { %v1536_v11 = vadd.f32 %v1532_v9, %v1223_v7  ;;  %v2896_v10 = vpop.f32.mrb[23].mxu0 }
0x19a3   :  { %3195 = vtanh.f32 %v1536_v11  ;;  %v2599_v14 = vmul.f32 -1.442695, %v1536_v11 }
0x19a5   :  { %3197 = vpow2.f32 %v2599_v14 }
0x19ad   :  { %v3196_v12 = vpop.eup %3195 }
0x19ae   :  { %1546 = vrot.lane.b32.xlu0 %v3196_v12, %s3252_s10 }
0x19af   :  { %v3198_v60 = vpop.eup %3197 }
0x19b0   :  { %v1540_v13 = vadd.f32 1.0, %v3198_v60 }
0x19b2   :  { %3199 = vrcp.f32 %v1540_v13 }
0x19bc   :  { %v3200_v62 = vpop.eup %3199 }
0x19bd   :  { %v1544_v17 = vmul.f32 %v3200_v62, %v1454_v59 }
0x1a20   :  { %v1547_v15 = vpop.permute.xlu0 %1546 }
0x1a21   :  { %v1549_v16 = vmul.f32 %v3200_v62, %v1547_v15 }
0x1a23   :  { %1551 = vrot.lane.b32.xlu1 %v1549_v16, %s3253_s12 }
0x1a95   :  { %v1552_v18 = vpop.permute.xlu1 %1551 }
0x1a96   :  { %v1554_v39 = vadd.f32 %v1552_v18, %v1544_v17 }
0x1a98   :  { %3201 = vtanh.f32 %v1554_v39 }
0x1aa2   :  { %v3202_v19 = vpop.eup %3201 }
0x1aa3   :  { %1557 = vrot.lane.b32.xlu0 %v3202_v19, %s3252_s10 }
0x1b15   :  { %v1558_v20 = vpop.permute.xlu0 %1557 }
0x1b16   :  { %v1560_v21 = vmul.f32 %v3200_v62, %v1558_v20 }
0x1b18   :  { %1562 = vrot.lane.b32.xlu1 %v1560_v21, %s3253_s12 }
0x1b8a   :  { %v1563_v22 = vpop.permute.xlu1 %1562 }
0x1b8b   :  { %2906 = vmatmul.mubr.msk.f32.vlgmr.msra.gmra.mrb[14].mxu1 %vm274_vm2, %v1563_v22 }
0x1b8c   :  { %3079 = vmatpush3.bf16.msra.mxu1 %v3592_v53  ;;  %2927 = vmatprep.mubr.msk.f32.mxu1 %vm3250_vm1, %v3251_v4 }
0x1b8d   :  { %3080 = vmatprep.subr.bf16.mxu1 %v3249_v0 }
0x1b90   :  { %3082 = vmatpush3.bf16.msra.mxu1 %v3602_v56 }
0x1b91   :  { %3089 = vmatprep.subr.bf16.mxu1 %v3249_v0 }
0x1c5e   :  { %v1632_v24 = vpop.f32.mrb[14].mxu1 }
0x1c5f   :  { %v1636_v25 = vadd.f32 %v1632_v24, %v1228_v23  ;;  %v2907_v26 = vpop.f32.mrb[15].mxu1 }
0x1c61   :  { %3203 = vtanh.f32 %v1636_v25  ;;  %v2601_v28 = vmul.f32 -1.442695, %v1636_v25 }
0x1c63   :  { %3205 = vpow2.f32 %v2601_v28 }
0x1c6b   :  { %v3204_v27 = vpop.eup %3203 }
0x1c6c   :  { %1646 = vrot.lane.b32.xlu0 %v3204_v27, %s3252_s10 }
0x1c6d   :  { %v3206_v29 = vpop.eup %3205 }
0x1c6e   :  { %v1640_v30 = vadd.f32 1.0, %v3206_v29 }
0x1c70   :  { %3207 = vrcp.f32 %v1640_v30 }
0x1c7a   :  { %v3208_v31 = vpop.eup %3207 }
0x1c7b   :  { %v1644_v34 = vmul.f32 %v3208_v31, %v1554_v39  ;;  %v1243_v39 = vadd.f32 %v3635_v8, %v3664_v2 }
0x1cde   :  { %v1647_v32 = vpop.permute.xlu0 %1646 }
0x1cdf   :  { %v1649_v33 = vmul.f32 %v3208_v31, %v1647_v32 }
0x1ce1   :  { %1651 = vrot.lane.b32.xlu1 %v1649_v33, %s3253_s12 }
0x1d53   :  { %v1652_v36 = vpop.permute.xlu1 %1651 }
0x1d54   :  { %v1654_v37 = vadd.f32 %v1652_v36, %v1644_v34  ;;  %v1248_v36 = vadd.f32 %v3662_v61, %v3635_v8 }
0x1d56   :  { %3209 = vtanh.f32 %v1654_v37 }
0x1d60   :  { %v3210_v38 = vpop.eup %3209 }
0x1d61   :  { %1657 = vrot.lane.b32.xlu0 %v3210_v38, %s3252_s10 }
0x1dd3   :  { %v1658_v42 = vpop.permute.xlu0 %1657 }
0x1dd4   :  { %v1660_v63 = vmul.f32 %v3208_v31, %v1658_v42 }
0x1dd6   :  { %1662 = vrot.lane.b32.xlu1 %v1660_v63, %s3253_s12 }
0x1e48   :  { %v1663_v43 = vpop.permute.xlu1 %1662 }
0x1e49   :  { %2917 = vmatmul.mubr.msk.f32.vlgmr.msra.gmra.mrb[24].mxu0 %vm274_vm2, %v1663_v43 }
0x1e4a   :  { %3085 = vmatpush3.bf16.msra.mxu0 %v3592_v53  ;;  %2938 = vmatprep.mubr.msk.f32.mxu0 %vm3250_vm1, %v3251_v4 }
0x1e4b   :  { %3086 = vmatprep.subr.bf16.mxu0 %v3249_v0 }
0x1e4e   :  { %3088 = vmatpush3.bf16.msra.mxu0 %v3602_v56 }
0x1e4f   :  { %2952 = vmatprep.subr.mxu0 %v3251_v4 }
0x1f1c   :  { %v1732_v45 = vpop.f32.mrb[24].mxu0 }
0x1f1d   :  { %v1736_v46 = vadd.f32 %v1732_v45, %v1233_v44  ;;  %v2918_v47 = vpop.f32.mrb[25].mxu0 }
0x1f1f   :  { %3211 = vtanh.f32 %v1736_v46  ;;  %v2603_v49 = vmul.f32 -1.442695, %v1736_v46 }
0x1f21   :  { %3213 = vpow2.f32 %v2603_v49 }
0x1f29   :  { %v3212_v48 = vpop.eup %3211 }
0x1f2a   :  { %1746 = vrot.lane.b32.xlu0 %v3212_v48, %s3252_s10 }
0x1f2b   :  { %v3214_v50 = vpop.eup %3213 }
0x1f2c   :  { %v1740_v51 = vadd.f32 1.0, %v3214_v50  ;;  %v2063_v50 = vld [vmem:[%s3887_s9] sm:$0x1f] }
0x1f2e   :  { %3215 = vrcp.f32 %v1740_v51  ;;  %v82_v51 = vld [vmem:[%s3846_s1] sm:$0xff] }
0x1f38   :  { %v3216_v35 = vpop.eup %3215 }
0x1f39   :  { %v1744_v55 = vmul.f32 %v3216_v35, %v1654_v37 }
0x1f9c   :  { %v1747_v52 = vpop.permute.xlu0 %1746 }
0x1f9d   :  { %v1749_v54 = vmul.f32 %v3216_v35, %v1747_v52  ;;  %v2219_v52 = vld [vmem:[%s3847_s15] sm:$0xff] }
0x1f9f   :  { %1751 = vrot.lane.b32.xlu1 %v1749_v54, %s3253_s12 }
0x2011   :  { %v1752_v57 = vpop.permute.xlu1 %1751 }
0x2012   :  { %v1754_v41 = vadd.f32 %v1752_v57, %v1744_v55  ;;  %v2220_v55 = vld [vmem:[%s3847_s15 + $0x8] sm:$0xff]  ;;  %v2221_v57 = vld [vmem:[%s3847_s15 + $0x10] sm:$0xff] }
0x2014   :  { %3217 = vtanh.f32 %v1754_v41 }
0x201e   :  { %v3218_v58 = vpop.eup %3217 }
0x201f   :  { %1757 = vrot.lane.b32.xlu0 %v3218_v58, %s3252_s10  ;;  %v2222_v58 = vld [vmem:[%s3847_s15 + $0x18] sm:$0xff] }
0x2091   :  { %v1758_v59 = vpop.permute.xlu0 %1757 }
0x2092   :  { %v1760_v1 = vmul.f32 %v3216_v35, %v1758_v59  ;;  %v84_v35 = vsel %vm83_vm4, %v82_v51, 0.0 }
0x2093   :  { %v85_v54 = vrot.slane %v84_v35, 4 }
0x2094   :  { %1762 = vrot.lane.b32.xlu1 %v1760_v1, %s3253_s12  ;;  %v3099_v1 = vpack.c.bf16 %v2222_v58, %v2221_v57 }
0x2095   :  { %v86_v59 = vadd.f32 %v85_v54, %v84_v35 }
0x2106   :  { %v1763_v3 = vpop.permute.xlu1 %1762 }
0x2107   :  { %2928 = vmatmul.mubr.msk.f32.vlgmr.msra.gmra.mrb[16].mxu1 %vm274_vm2, %v1763_v3  ;;  %v87_v3 = vrot.slane %v86_v59, 2 }
0x2108   :  { %3091 = vmatpush3.bf16.msra.mxu1 %v3592_v53  ;;  %2949 = vmatprep.mubr.msk.f32.mxu1 %vm3250_vm1, %v3251_v4 }
0x2109   :  { %3092 = vmatprep.subr.bf16.mxu1 %v3249_v0 }
0x210c   :  { %3094 = vmatpush3.bf16.msra.mxu1 %v3602_v56 }
0x210d   :  { %3095 = vmatprep.subr.bf16.mxu1 %v3249_v0 }
0x21da   :  { %v1832_v5 = vpop.f32.mrb[16].mxu1 }
0x21db   :  { %v1836_v7 = vadd.f32 %v1832_v5, %v1238_v6  ;;  %v2929_v9 = vpop.f32.mrb[17].mxu1  ;;  %v88_v6 = vadd.f32 %v87_v3, %v86_v59 }
0x21dd   :  { %3219 = vtanh.f32 %v1836_v7  ;;  %v2605_v53 = vmul.f32 -1.442695, %v1836_v7  ;;  %v89_v7 = vrot.slane %v88_v6, 1 }
0x21df   :  { %3221 = vpow2.f32 %v2605_v53  ;;  %v90_v9 = vadd.f32 %v89_v7, %v88_v6  ;;  %v2616_v6 = vld [vmem:[%s3854_s17] ss:$0 sm:$0xff] }
0x21e0   :  { %v2617_v7 = vld [vmem:[%s3855_s18] ss:$0 sm:$0xff] }
0x21e7   :  { %v3220_v11 = vpop.eup %3219 }
0x21e8   :  { %1846 = vrot.lane.b32.xlu0 %v3220_v11, %s3252_s10  ;;  %v92_v11 = vmul.f32 0.125, %v90_v9 }
0x21e9   :  { %v3222_v10 = vpop.eup %3221 }
0x21ea   :  { %v1840_v12 = vadd.f32 1.0, %v3222_v10  ;;  %v93_v53 = vsub.f32 %v82_v51, %v92_v11 }
0x21ec   :  { %3223 = vrcp.f32 %v1840_v12  ;;  %v94_v10 = vmul.f32 %v93_v53, %v93_v53 }
0x21ee   :  { %v95_v12 = vsel %vm83_vm4, %v94_v10, 0.0  ;;  %v2469_v10 = vld [vmem:[%s3856_s23 + $0x8] sm:$0xff] }
0x21f6   :  { %v3224_v14 = vpop.eup %3223 }
0x21f7   :  { %v1844_v13 = vmul.f32 %v3224_v14, %v1754_v41  ;;  %v3096_v41 = vpack.c.bf16 %v2220_v55, %v2219_v52 }
0x225a   :  { %v1847_v60 = vpop.permute.xlu0 %1846 }
0x225b   :  { %v1849_v56 = vmul.f32 %v3224_v14, %v1847_v60 }
0x225d   :  { %1851 = vrot.lane.b32.xlu1 %v1849_v56, %s3253_s12 }
0x22cf   :  { %v1852_v62 = vpop.permute.xlu1 %1851 }
0x22d0   :  { %v1854_v40 = vadd.f32 %v1852_v62, %v1844_v13 }
0x22d2   :  { %3225 = vtanh.f32 %v1854_v40 }
0x22dc   :  { %v3226_v15 = vpop.eup %3225 }
0x22dd   :  { %1857 = vrot.lane.b32.xlu0 %v3226_v15, %s3252_s10 }
0x234f   :  { %v1858_v16 = vpop.permute.xlu0 %1857 }
0x2350   :  { %v1860_v17 = vmul.f32 %v3224_v14, %v1858_v16  ;;  %v96_v14 = vrot.slane %v95_v12, 4 }
0x2352   :  { %1862 = vrot.lane.b32.xlu1 %v1860_v17, %s3253_s12  ;;  %v97_v60 = vadd.f32 %v96_v14, %v95_v12  ;;  %v30_v14 = vstv %s3857_s24 }
0x2353   :  { %31 = vst [vmem:[#allocation3] sm:$0x1] %v30_v14 }
0x2354   :  { %v98_v56 = vrot.slane %v97_v60, 2 }
0x2356   :  { %v99_v13 = vadd.f32 %v98_v56, %v97_v60  ;;  %v2618_v60 = vld [vmem:[%s3858_s20] ss:$0 sm:$0xff] }
0x2358   :  { %v100_v62 = vrot.slane %v99_v13, 1 }
0x23c4   :  { %v1863_v18 = vpop.permute.xlu1 %1862 }
0x23c5   :  { %2939 = vmatmul.mubr.msk.f32.vlgmr.msra.gmra.mrb[26].mxu0 %vm274_vm2, %v1863_v18  ;;  %v2556_v18 = vld [vmem:[%s3848_s2] ss:$0 sm:$0xff] }
0x23c6   :  { %2954 = vmatprep.mubr.msk.f32.mxu0 %vm3250_vm1, %v3251_v4  ;;  %2953 = vmatpush3.msk.msra.mxu0 %vm2067_vm3, %v2063_v50 }
0x23c7   :  { %2957 = vmatprep.subr.mxu0 %v3251_v4 }
0x2498   :  { %v1932_v19 = vpop.f32.mrb[26].mxu0 }
0x2499   :  { %v1936_v20 = vadd.f32 %v1932_v19, %v1243_v39  ;;  %v2940_v21 = vpop.f32.mrb[27].mxu0  ;;  %v2557_v19 = vld [vmem:[%s3849_s3] ss:$0 sm:$0xff] }
0x249b   :  { %3227 = vtanh.f32 %v1936_v20  ;;  %v2607_v23 = vmul.f32 -1.442695, %v1936_v20 }
0x249d   :  { %3229 = vpow2.f32 %v2607_v23  ;;  %v2061_v23 = vld [vmem:[%s3851_s0] sm:$0xff] }
0x24a5   :  { %v3228_v22 = vpop.eup %3227 }
0x24a6   :  { %1946 = vrot.lane.b32.xlu0 %v3228_v22, %s3252_s10  ;;  %v2062_v22 = vld [vmem:[%s3850_s13] sm:$0x7f] }
0x24a7   :  { %v3230_v24 = vpop.eup %3229 }
0x24a8   :  { %v1940_v25 = vadd.f32 1.0, %v3230_v24 }
0x24aa   :  { %3231 = vrcp.f32 %v1940_v25 }
0x24b4   :  { %v3232_v26 = vpop.eup %3231 }
0x24b5   :  { %v1944_v29 = vmul.f32 %v3232_v26, %v1854_v40  ;;  %v101_v40 = vadd.f32 %v100_v62, %v99_v13 }
0x24b7   :  { %v102_v15 = vmul.f32 0.125, %v101_v40 }
0x24b9   :  { %v103_v16 = vadd.f32 1e-05, %v102_v15 }
0x2518   :  { %v1947_v27 = vpop.permute.xlu0 %1946 }
0x2519   :  { %v1949_v28 = vmul.f32 %v3232_v26, %v1947_v27 }
0x251b   :  { %1951 = vrot.lane.b32.xlu1 %v1949_v28, %s3253_s12 }
0x258d   :  { %v1952_v30 = vpop.permute.xlu1 %1951 }
0x258e   :  { %v1954_v2 = vadd.f32 %v1952_v30, %v1944_v29 }
0x2590   :  { %3233 = vtanh.f32 %v1954_v2 }
0x259a   :  { %v3234_v31 = vpop.eup %3233 }
0x259b   :  { %1957 = vrot.lane.b32.xlu0 %v3234_v31, %s3252_s10  ;;  %v2345_v31 = vld [vmem:[%s3852_s19] sm:$0xff] }
0x260d   :  { %v1958_v32 = vpop.permute.xlu0 %1957 }
0x260e   :  { %v1960_v33 = vmul.f32 %v3232_v26, %v1958_v32  ;;  %v2346_v32 = vld [vmem:[%s3852_s19 + $0x8] sm:$0xff] }
0x2610   :  { %1962 = vrot.lane.b32.xlu1 %v1960_v33, %s3253_s12  ;;  %v3102_v33 = vpack.c.bf16 %v2346_v32, %v2345_v31 }
0x2682   :  { %v1963_v34 = vpop.permute.xlu1 %1962 }
0x2683   :  { %2950 = vmatmul.mubr.msk.f32.vlgmr.msra.gmra.mrb[18].mxu1 %vm274_vm2, %v1963_v34  ;;  %v2348_v34 = vld [vmem:[%s3852_s19 + $0x18] sm:$0xff] }
0x2684   :  { %2970 = vmatprep.mubr.msk.f32.mxu1 %vm3250_vm1, %v3251_v4  ;;  %3097 = vmatpush3.bf16.msra.mxu1 %v3096_v41 }
0x2685   :  { %3098 = vmatprep.subr.bf16.mxu1 %v3249_v0 }
0x2688   :  { %3100 = vmatpush3.bf16.msra.mxu1 %v3099_v1 }
0x2689   :  { %3107 = vmatprep.subr.bf16.mxu1 %v3249_v0 }
0x2756   :  { %v2032_v37 = vpop.f32.mrb[18].mxu1 }
0x2757   :  { %v2036_v38 = vadd.f32 %v2032_v37, %v1248_v36  ;;  %v2951_v42 = vpop.f32.mrb[19].mxu1 }
0x2759   :  { %3235 = vtanh.f32 %v2036_v38  ;;  %v2609_v43 = vmul.f32 -1.442695, %v2036_v38  ;;  %v2615_v38 = vld [vmem:[%s3853_s16] ss:$0 sm:$0xff] }
0x275b   :  { %3237 = vpow2.f32 %v2609_v43 }
0x2763   :  { %v3236_v63 = vpop.eup %3235 }
0x2764   :  { %2046 = vrot.lane.b32.xlu0 %v3236_v63, %s3252_s10 }
0x2765   :  { %v3238_v44 = vpop.eup %3237 }
0x2766   :  { %v2040_v45 = vadd.f32 1.0, %v3238_v44 }
0x2768   :  { %3239 = vrcp.f32 %v2040_v45 }
0x2772   :  { %v3735_v46 = vpop.eup %3239 }
0x2773   :  { %v2044_v8 = vmul.f32 %v3735_v46, %v1954_v2 }
0x27d6   :  { %v2047_v47 = vpop.permute.xlu0 %2046 }
0x27d7   :  { %v2049_v48 = vmul.f32 %v3735_v46, %v2047_v47 }
0x27d9   :  { %2051 = vrot.lane.b32.xlu1 %v2049_v48, %s3253_s12 }
0x284b   :  { %v2052_v61 = vpop.permute.xlu1 %2051 }
0x284c   :  { %v2054_v49 = vadd.f32 %v2052_v61, %v2044_v8 }
0x284e   :  { %3241 = vtanh.f32 %v2054_v49 }
0x284f   :  { %3243 = vrsqrt.f32 %v103_v16 }
0x2858   :  { %v3242_v5 = vpop.eup %3241 }
0x2859   :  { %2057 = vrot.lane.b32.xlu0 %v3242_v5, %s3252_s10  ;;  %v3244_v17 = vpop.eup %3243 }
0x285a   :  { %v105_v39 = vmul.f32 %v3244_v17, %v93_v53  ;;  %v2468_v53 = vld [vmem:[%s3856_s23] sm:$0xff] }
0x285b   :  { %v3108_v12 = vpack.c.bf16 %v2469_v10, %v2468_v53 }
0x285c   :  { %v113_v20 = vmul.f32 %v2556_v18, %v105_v39 }
0x285e   :  { %v121_v21 = vadd.f32 %v2557_v19, %v113_v20 }
0x2860   :  { %2955 = vmatmul.mubr.msk.f32.vlgmr.msra.gmra.mrb[28].mxu0 %vm83_vm4, %v121_v21 }
0x2861   :  { %2958 = vmatpush3.msk.msra.mxu0 %vm2145_vm5, %v2062_v22  ;;  %2959 = vmatprep.mubr.msk.f32.mxu0 %vm3250_vm1, %v3251_v4 }
0x2862   :  { %3101 = vmatprep.subr.bf16.mxu0 %v3249_v0 }
0x2864   :  { %2960 = vmatmul.mubr.msk.f32.vlgmr.msra.gmra.mrb[30].mxu0 %vm2141_vm6, %v2061_v23 }
0x2865   :  { %2981 = vmatprep.mubr.msk.f32.mxu0 %vm3250_vm1, %v3251_v4  ;;  %3103 = vmatpush3.bf16.msra.mxu0 %v3102_v33  ;;  %v2620_v33 = vld [vmem:[%s3859_s21] ss:$0 sm:$0xff] }
0x2866   :  { %3104 = vmatprep.subr.bf16.mxu0 %v3249_v0 }
0x28cb   :  { %v2058_v24 = vpop.permute.xlu0 %2057 }
0x28cc   :  { %v2060_v25 = vmul.f32 %v3735_v46, %v2058_v24 }
0x28ce   :  { %2224 = vrot.lane.b32.xlu1 %v2060_v25, %s3253_s12 }
0x2933   :  { %v2137_v27 = vpop.f32.mrb[28].mxu0 }
0x2934   :  { %v2956_v28 = vpop.f32.mrb[29].mxu0 }
0x2937   :  { %v2215_v29 = vpop.f32.mrb[30].mxu0 }
0x2938   :  { %v2216_v30 = vadd.f32 %v2215_v29, %v2137_v27  ;;  %v2961_v2 = vpop.f32.mrb[31].mxu0 }
0x2940   :  { %v2225_v26 = vpop.permute.xlu1 %2224 }
0x2941   :  { %2971 = vmatmul.mubr.msk.f32.vlgmr.msra.gmra.mrb[20].mxu1 %vm274_vm2, %v2225_v26 }
0x2942   :  { %2988 = vmatprep.mubr.msk.f32.mxu1 %vm3250_vm1, %v3251_v4  ;;  %v2347_v4 = vld [vmem:[%s3852_s19 + $0x10] sm:$0xff]  ;;  %3109 = vmatpush3.bf16.msra.mxu1 %v3108_v12 }
0x2943   :  { %v3105_v36 = vpack.c.bf16 %v2348_v34, %v2347_v4  ;;  %v2621_v34 = vld [vmem:[%s3860_s22] ss:$0 sm:$0xff] }
0x2945   :  { %3106 = vmatpush3.bf16.msra.mxu0 %v3105_v36 }
0x2a14   :  { %v2294_v37 = vpop.f32.mrb[20].mxu1 }
0x2a15   :  { %v2298_v42 = vadd.f32 %v2294_v37, %v2216_v30  ;;  %v2972_v63 = vpop.f32.mrb[21].mxu1 }
0x2a17   :  { %v2306_v43 = vadd.f32 %v2615_v38, %v2298_v42  ;;  %v2622_v38 = vld [vmem:[#allocation3] ss:$0 sm:$0xff] }
0x2a19   :  { %v2307_v44 = vmax.f32 %v2306_v43, 0.0 }
0x2a1b   :  { %v2308_v0 = vsel %vm274_vm2, %v2307_v44, 0.0 }
0x2a1c   :  { %v2309_v45 = vrot.slane %v2308_v0, 4 }
0x2a1e   :  { %v2310_v46 = vadd.f32 %v2309_v45, %v2308_v0 }
0x2a20   :  { %v2311_v47 = vrot.slane %v2310_v46, 2 }
0x2a22   :  { %v2312_v48 = vadd.f32 %v2311_v47, %v2310_v46 }
0x2a24   :  { %v2313_v8 = vrot.slane %v2312_v48, 1 }
0x2a26   :  { %v2314_v61 = vadd.f32 %v2313_v8, %v2312_v48 }
0x2a28   :  { %v2315_v49 = vmul.f32 0.125, %v2314_v61 }
0x2a2a   :  { %v2316_v50 = vsub.f32 %v2307_v44, %v2315_v49 }
0x2a2c   :  { %v2317_v51 = vmul.f32 %v2316_v50, %v2316_v50 }
0x2a2e   :  { %v2318_v35 = vsel %vm274_vm2, %v2317_v51, 0.0 }
0x2a2f   :  { %v2319_v52 = vrot.slane %v2318_v35, 4 }
0x2a31   :  { %v2320_v54 = vadd.f32 %v2319_v52, %v2318_v35 }
0x2a33   :  { %v2321_v55 = vrot.slane %v2320_v54, 2 }
0x2a35   :  { %v2322_v57 = vadd.f32 %v2321_v55, %v2320_v54 }
0x2a37   :  { %v2323_v41 = vrot.slane %v2322_v57, 1 }
0x2a39   :  { %v2324_v58 = vadd.f32 %v2323_v41, %v2322_v57 }
0x2a3b   :  { %v2325_v59 = vmul.f32 0.125, %v2324_v58 }
0x2a3d   :  { %v2326_v1 = vadd.f32 1e-05, %v2325_v59 }
0x2a3f   :  { %3245 = vrsqrt.f32 %v2326_v1 }
0x2a49   :  { %v3246_v3 = vpop.eup %3245 }
0x2a4a   :  { %v2328_v5 = vmul.f32 %v3246_v3, %v2316_v50 }
0x2a4c   :  { %v2336_v9 = vmul.f32 %v2616_v6, %v2328_v5 }
0x2a4e   :  { %v2344_v11 = vadd.f32 %v2617_v7, %v2336_v9 }
0x2a50   :  { %2982 = vmatmul.mubr.msk.f32.vlgmr.msra.gmra.mrb[32].mxu0 %vm274_vm2, %v2344_v11 }
0x2b23   :  { %v2425_v56 = vpop.f32.mrb[32].mxu0 }
0x2b24   :  { %v2426_v13 = vadd.f32 %v2618_v60, %v2425_v56  ;;  %v2983_v62 = vpop.f32.mrb[33].mxu0 }
0x2b26   :  { %v2429_v40 = vmax.f32 %v2426_v13, 0.0 }
0x2b28   :  { %v2431_v15 = vsel %vm2430_vm7, %v2429_v40, 0.0 }
0x2b29   :  { %v2432_v16 = vrot.slane %v2431_v15, 4 }
0x2b2b   :  { %v2433_v17 = vadd.f32 %v2432_v16, %v2431_v15 }
0x2b2d   :  { %v2434_v18 = vrot.slane %v2433_v17, 2 }
0x2b2f   :  { %v2435_v39 = vadd.f32 %v2434_v18, %v2433_v17 }
0x2b31   :  { %v2436_v19 = vrot.slane %v2435_v39, 1 }
0x2b33   :  { %v2437_v20 = vadd.f32 %v2436_v19, %v2435_v39 }
0x2b35   :  { %v2438_v21 = vmul.f32 0.125, %v2437_v20 }
0x2b37   :  { %v2439_v22 = vsub.f32 %v2429_v40, %v2438_v21 }
0x2b39   :  { %v2440_v23 = vmul.f32 %v2439_v22, %v2439_v22 }
0x2b3b   :  { %v2441_v24 = vsel %vm2430_vm7, %v2440_v23, 0.0 }
0x2b3c   :  { %v2442_v25 = vrot.slane %v2441_v24, 4 }
0x2b3e   :  { %v2443_v26 = vadd.f32 %v2442_v25, %v2441_v24 }
0x2b40   :  { %v2444_v27 = vrot.slane %v2443_v26, 2 }
0x2b42   :  { %v2445_v28 = vadd.f32 %v2444_v27, %v2443_v26 }
0x2b44   :  { %v2446_v29 = vrot.slane %v2445_v28, 1 }
0x2b46   :  { %v2447_v30 = vadd.f32 %v2446_v29, %v2445_v28 }
0x2b48   :  { %v2448_v2 = vmul.f32 0.125, %v2447_v30 }
0x2b4a   :  { %v2449_v31 = vadd.f32 1e-05, %v2448_v2 }
0x2b4c   :  { %3247 = vrsqrt.f32 %v2449_v31 }
0x2b56   :  { %v3248_v32 = vpop.eup %3247 }
0x2b57   :  { %v2451_v4 = vmul.f32 %v3248_v32, %v2439_v22 }
0x2b59   :  { %v2459_v36 = vmul.f32 %v2620_v33, %v2451_v4 }
0x2b5b   :  { %v2467_v37 = vadd.f32 %v2621_v34, %v2459_v36 }
0x2b5d   :  { %2989 = vmatmul.mubr.msk.f32.vlgmr.msra.gmra.mrb[22].mxu1 %vm2430_vm7, %v2467_v37 }
0x2c30   :  { %v2546_v42 = vpop.f32.mrb[22].mxu1 }
0x2c31   :  { %v2547_v63 = vadd.f32 %v2622_v38, %v2546_v42  ;;  %v2990_v43 = vpop.f32.mrb[23].mxu1 }
0x2c33   :  { %2551 = vst.msk [vmem:[%s3861_s25] sm:$0xff] %vm2550_vm8, %v2547_v63 }

</bundles_post_ra>
